<compile_context>
chip_gen: v6e
topology: v6e:2x2x1
jax: 0.10.0
libtpu: 0.0.40
codegen_flags: <defaults>
</compile_context>

<pallas_src>
import functools

import jax
import jax.numpy as jnp
from jax.experimental import pallas as pl
from jax.experimental.pallas import tpu as pltpu


# ----------------------------- in-kernel helpers -----------------------------

def _layernorm(x, gamma, beta, eps=1e-5):
    # PyTorch nn.LayerNorm over last dim (biased variance), f32 math.
    mu = jnp.mean(x, axis=-1, keepdims=True)
    var = jnp.mean((x - mu) ** 2, axis=-1, keepdims=True)
    return (x - mu) * jax.lax.rsqrt(var + eps) * gamma + beta


# ----------------------------- fused stack kernel -----------------------------

def encoder_stack_kernel(x_ref, g1_ref, be1_ref, wqkv_ref, wout_ref, bout_ref,
                         g2_ref, be2_ref, w1_ref, fb1_ref, w2_ref, fb2_ref,
                         o_ref, acc_ref, *, heads, dim_head):
    """Grid = (batch_block b, layer l). acc_ref carries the residual across layers."""
    layer = pl.program_id(1)
    TB, N, D = x_ref.shape
    R = TB * N
    inner = heads * dim_head

    # ---- layer 0: load this batch block's activations into the f32 accumulator ----
    @pl.when(layer == 0)
    def _():
        acc_ref[...] = x_ref[...].reshape(R, D).astype(jnp.float32)

    x = acc_ref[...]                                       # (R, D) f32 residual stream

    # ---------------- attention block ----------------
    xn = _layernorm(x, g1_ref[0], be1_ref[0])              # f32, gamma/beta are (1, D)
    # W_qkv already has the 1/sqrt(dh) scale folded into its Q columns (done in wrapper).
    qkv = jnp.dot(xn.astype(jnp.bfloat16), wqkv_ref[0],
                  preferred_element_type=jnp.float32)      # (R, 3*inner) f32
    q = qkv[:, 0 * inner:1 * inner].reshape(TB, N, inner)
    k = qkv[:, 1 * inner:2 * inner].reshape(TB, N, inner)
    v = qkv[:, 2 * inner:3 * inner].reshape(TB, N, inner)

    # Accumulate out-projection per head directly into the residual (no concatenate).
    y = x + bout_ref[0]                                    # residual + out-proj bias, f32
    for h in range(heads):                                 # static head loop
        sl = slice(h * dim_head, (h + 1) * dim_head)
        qh = q[:, :, sl].astype(jnp.bfloat16)              # (TB, N, dh)
        kh = k[:, :, sl].astype(jnp.bfloat16)
        vh = v[:, :, sl].astype(jnp.bfloat16)
        s = jnp.einsum('bnd,bmd->bnm', qh, kh,
                       preferred_element_type=jnp.float32)       # (TB, N, N)
        s = s - jnp.max(s, axis=-1, keepdims=True)
        p = jnp.exp(s)
        p = p * pl.reciprocal(jnp.sum(p, axis=-1, keepdims=True), approx=True)
        oh = jnp.einsum('bnm,bmd->bnd', p.astype(jnp.bfloat16), vh,
                        preferred_element_type=jnp.float32)      # (TB, N, dh)
        # head-slice of W_out: (dh, D); equivalent to concat(heads) @ W_out
        y = y + jnp.dot(oh.reshape(R, dim_head).astype(jnp.bfloat16), wout_ref[0, h],
                        preferred_element_type=jnp.float32)

    # ---------------- feed-forward block ----------------
    yn = _layernorm(y, g2_ref[0], be2_ref[0])
    h1 = jnp.dot(yn.astype(jnp.bfloat16), w1_ref[0],
                 preferred_element_type=jnp.float32) + fb1_ref[0]
    # TODO(synk): PyTorch nn.GELU() default is exact erf GELU; tanh approximation used here.
    h1 = jax.nn.gelu(h1, approximate=True)
    h2 = jnp.dot(h1.astype(jnp.bfloat16), w2_ref[0],
                 preferred_element_type=jnp.float32) + fb2_ref[0]

    out = h2 + y
    acc_ref[...] = out                                     # carry residual to next layer

    # ---- last layer: flush to the (lane-dense) HBM output block ----
    @pl.when(layer == pl.num_programs(1) - 1)
    def _():
        o_ref[...] = out.reshape(TB, N, D).astype(o_ref.dtype)


# ----------------------------- pallas_call wrapper -----------------------------

def _pick_block_b(B, N, target_rows=256):
    """Largest divisor of B such that block rows (TB*N) stay near target_rows."""
    target = max(1, (target_rows + N - 1) // N)
    best = 1
    for d in range(1, B + 1):
        if B % d == 0 and d <= target:
            best = d
    return best


def encoder_transformer(x, params, *, heads, dim_head, block_b=None):
    """Forward pass of the whole encoder stack as a single fused Pallas kernel."""
    B, N, D = x.shape
    depth = len(params)
    inner = heads * dim_head
    hidden = params[0]["w1"].shape[1]
    scale = dim_head ** -0.5

    tb = block_b if block_b is not None else _pick_block_b(B, N)
    assert B % tb == 0

    # ---- trace-time weight preprocessing (plain JAX, tiny) ----
    def stack(name):
        return jnp.stack([p[name] for p in params], axis=0)

    wqkv = stack("wqkv")                                       # (L, D, 3*inner)
    # fold softmax scale into Q columns; matmul weights as bf16
    wqkv = jnp.concatenate([wqkv[:, :, :inner] * scale, wqkv[:, :, inner:]],
                           axis=-1).astype(jnp.bfloat16)
    wout = stack("wout").reshape(depth, heads, dim_head, D).astype(jnp.bfloat16)
    w1 = stack("w1").astype(jnp.bfloat16)                      # (L, D, hidden)
    w2 = stack("w2").astype(jnp.bfloat16)                      # (L, hidden, D)
    # 1-D params stacked as (L, 1, dim) so BlockSpec last-two dims == full array dims.
    ln1_g = stack("ln1_g").reshape(depth, 1, D)
    ln1_b = stack("ln1_b").reshape(depth, 1, D)
    bout = stack("bout").reshape(depth, 1, D)
    ln2_g = stack("ln2_g").reshape(depth, 1, D)
    ln2_b = stack("ln2_b").reshape(depth, 1, D)
    b1 = stack("b1").reshape(depth, 1, hidden)
    b2 = stack("b2").reshape(depth, 1, D)

    kernel = functools.partial(encoder_stack_kernel, heads=heads, dim_head=dim_head)

    # per-layer weight blocks (index by l) -> BlockSpec pipelines layer l+1 weight DMA
    def wspec(shape):
        nd = len(shape)
        return pl.BlockSpec((1,) + shape[1:], lambda b, l: (l,) + (0,) * (nd - 1))

    return pl.pallas_call(
        kernel,
        out_shape=jax.ShapeDtypeStruct((B, N, D), x.dtype),
        grid=(B // tb, depth),                        # depth innermost (serial carry)
        in_specs=[
            pl.BlockSpec((tb, N, D), lambda b, l: (b, 0, 0)),   # x (constant over l)
            wspec(ln1_g.shape),
            wspec(ln1_b.shape),
            wspec(wqkv.shape),
            wspec(wout.shape),
            wspec(bout.shape),
            wspec(ln2_g.shape),
            wspec(ln2_b.shape),
            wspec(w1.shape),
            wspec(b1.shape),
            wspec(w2.shape),
            wspec(b2.shape),
        ],
        out_specs=pl.BlockSpec((tb, N, D), lambda b, l: (b, 0, 0)),
        scratch_shapes=[pltpu.VMEM((tb * N, D), jnp.float32)],   # residual carry
        compiler_params=pltpu.CompilerParams(
            dimension_semantics=("parallel", "arbitrary"),   # batch blocks -> megacore
        ),
    )(x, ln1_g, ln1_b, wqkv, wout, bout, ln2_g, ln2_b, w1, b1, w2, b2)


# ----------------------------- parameter init --------------------------------

def init_params(key, *, dim, depth, heads, dim_head, inner_dim_scale):
    inner = heads * dim_head
    hidden = dim * inner_dim_scale
    params = []
    for _ in range(depth):
        key, k1, k2, k3, k4 = jax.random.split(key, 5)
        params.append({
            "ln1_g": jnp.ones((dim,), jnp.float32),
            "ln1_b": jnp.zeros((dim,), jnp.float32),
            "wqkv": 0.02 * jax.random.normal(k1, (dim, 3 * inner), jnp.float32),  # bias=False
            "wout": 0.02 * jax.random.normal(k2, (inner, dim), jnp.float32),
            "bout": jnp.zeros((dim,), jnp.float32),
            "ln2_g": jnp.ones((dim,), jnp.float32),
            "ln2_b": jnp.zeros((dim,), jnp.float32),
            "w1": 0.02 * jax.random.normal(k3, (dim, hidden), jnp.float32),
            "b1": jnp.zeros((hidden,), jnp.float32),
            "w2": 0.02 * jax.random.normal(k4, (hidden, dim), jnp.float32),
            "b2": jnp.zeros((dim,), jnp.float32),
        })
    return params


# ----------------------------- pure-JAX reference -----------------------------

def _ref_forward(x, params, *, heads, dim_head):
    def ln(x, g, b):
        mu = jnp.mean(x, axis=-1, keepdims=True)
        var = jnp.mean((x - mu) ** 2, axis=-1, keepdims=True)
        return (x - mu) / jnp.sqrt(var + 1e-5) * g + b

    inner = heads * dim_head
    scale = dim_head ** -0.5
    for p in params:
        h = ln(x, p["ln1_g"], p["ln1_b"])
        qkv = h @ p["wqkv"]
        q, k, v = jnp.split(qkv, 3, axis=-1)
        B, N, _ = q.shape
        q = q.reshape(B, N, heads, dim_head).transpose(0, 2, 1, 3)
        k = k.reshape(B, N, heads, dim_head).transpose(0, 2, 1, 3)
        v = v.reshape(B, N, heads, dim_head).transpose(0, 2, 1, 3)
        dots = jnp.einsum("bhnd,bhmd->bhnm", q, k) * scale
        prob = jax.nn.softmax(dots, axis=-1)
        out = jnp.einsum("bhnm,bhmd->bhnd", prob, v)
        out = out.transpose(0, 2, 1, 3).reshape(B, N, inner)
        x = out @ p["wout"] + p["bout"] + x

        h = ln(x, p["ln2_g"], p["ln2_b"])
        h1 = jax.nn.gelu(h @ p["w1"] + p["b1"], approximate=True)
        x = h1 @ p["w2"] + p["b2"] + x
    return x


# ----------------------------- main -------------------------------------------

if __name__ == "__main__":
    # Small config consistent with the module's __init__ (D chosen lane-dense = 128).
    dim, depth, heads, dim_head, inner_dim_scale = 128, 2, 4, 32, 4
    B, N = 2, 16

    key = jax.random.PRNGKey(0)
    kx, kp = jax.random.split(key)
    x = jax.random.normal(kx, (B, N, dim), jnp.float32)       # (B, N, D)
    params = init_params(kp, dim=dim, depth=depth, heads=heads,
                         dim_head=dim_head, inner_dim_scale=inner_dim_scale)

    fwd = jax.jit(functools.partial(encoder_transformer, heads=heads, dim_head=dim_head))
    out = jax.block_until_ready(fwd(x, params))

    ref = _ref_forward(x, params, heads=heads, dim_head=dim_head)
    assert out.shape == (B, N, dim)
    max_err = float(jnp.max(jnp.abs(out - ref)))
    # bf16 matmul operands (f32 accumulation) vs f32 reference -> loosened tolerance.
    assert jnp.allclose(out, ref, rtol=2e-2, atol=2e-2), f"mismatch vs reference (max abs err {max_err})"

    print("KERNEL_OK")
</pallas_src>

<mosaic_0001>
module attributes {stable_mosaic.version = 11 : i64} {
  func.func @encoder_stack_kernel(%arg0: i32, %arg1: i32, %arg2: memref<2x16x128xf32, #tpu.memory_space<vmem>>, %arg3: memref<1x1x128xf32, #tpu.memory_space<vmem>>, %arg4: memref<1x1x128xf32, #tpu.memory_space<vmem>>, %arg5: memref<1x128x384xbf16, #tpu.memory_space<vmem>>, %arg6: memref<1x4x32x128xbf16, #tpu.memory_space<vmem>>, %arg7: memref<1x1x128xf32, #tpu.memory_space<vmem>>, %arg8: memref<1x1x128xf32, #tpu.memory_space<vmem>>, %arg9: memref<1x1x128xf32, #tpu.memory_space<vmem>>, %arg10: memref<1x128x512xbf16, #tpu.memory_space<vmem>>, %arg11: memref<1x1x512xf32, #tpu.memory_space<vmem>>, %arg12: memref<1x512x128xbf16, #tpu.memory_space<vmem>>, %arg13: memref<1x1x128xf32, #tpu.memory_space<vmem>>, %arg14: memref<2x16x128xf32, #tpu.memory_space<vmem>>, %arg15: memref<32x128xf32, #tpu.memory_space<vmem>>) attributes {dimension_semantics = [#tpu.dimension_semantics<parallel>, #tpu.dimension_semantics<arbitrary>], iteration_bounds = array<i64: 1, 2>, scalar_prefetch = 0 : i64, scratch_operands = 1 : i64, tpu.core_type = #tpu.core_type<tc>, window_params = [{transform_indices = @transform_0, window_bounds = array<i64: 2, 16, 128>}, {transform_indices = @transform_1, window_bounds = array<i64: 1, 1, 128>}, {transform_indices = @transform_2, window_bounds = array<i64: 1, 1, 128>}, {transform_indices = @transform_3, window_bounds = array<i64: 1, 128, 384>}, {transform_indices = @transform_4, window_bounds = array<i64: 1, 4, 32, 128>}, {transform_indices = @transform_5, window_bounds = array<i64: 1, 1, 128>}, {transform_indices = @transform_6, window_bounds = array<i64: 1, 1, 128>}, {transform_indices = @transform_7, window_bounds = array<i64: 1, 1, 128>}, {transform_indices = @transform_8, window_bounds = array<i64: 1, 128, 512>}, {transform_indices = @transform_9, window_bounds = array<i64: 1, 1, 512>}, {transform_indices = @transform_10, window_bounds = array<i64: 1, 512, 128>}, {transform_indices = @transform_11, window_bounds = array<i64: 1, 1, 128>}, {transform_indices = @transform_12, window_bounds = array<i64: 2, 16, 128>}]} {
    %c0_i32 = arith.constant 0 : i32
    %0 = arith.cmpi eq, %arg1, %c0_i32 : i32
    %1 = arith.extui %0 : i1 to i32
    %c0_i32_0 = arith.constant 0 : i32
    %2 = arith.cmpi ne, %1, %c0_i32_0 : i32
    scf.if %2 {
      %c0_84 = arith.constant 0 : index
      %c0_85 = arith.constant 0 : index
      %c0_86 = arith.constant 0 : index
      %204 = vector.load %arg2[%c0_84, %c0_85, %c0_86] : memref<2x16x128xf32, #tpu.memory_space<vmem>>, vector<2x16x128xf32>
      %205 = vector.shape_cast %204 : vector<2x16x128xf32> to vector<32x128xf32>
      %c0_87 = arith.constant 0 : index
      %c0_88 = arith.constant 0 : index
      %206 = vector.load %arg15[%c0_87, %c0_88] : memref<32x128xf32, #tpu.memory_space<vmem>>, vector<32x128xf32>
      tpu.vector_store %arg15[%c0_87, %c0_88], %205 {strides = array<i32>} : memref<32x128xf32, #tpu.memory_space<vmem>>, vector<32x128xf32>,
    } else {
    }
    %c0 = arith.constant 0 : index
    %c0_1 = arith.constant 0 : index
    %3 = vector.load %arg15[%c0, %c0_1] : memref<32x128xf32, #tpu.memory_space<vmem>>, vector<32x128xf32>
    %c0_2 = arith.constant 0 : index
    %c0_3 = arith.constant 0 : index
    %c0_4 = arith.constant 0 : index
    %4 = vector.load %arg3[%c0_2, %c0_3, %c0_4] : memref<1x1x128xf32, #tpu.memory_space<vmem>>, vector<1x1x128xf32>
    %5 = vector.shape_cast %4 : vector<1x1x128xf32> to vector<1x128xf32>
    %c0_5 = arith.constant 0 : index
    %c0_6 = arith.constant 0 : index
    %c0_7 = arith.constant 0 : index
    %6 = vector.load %arg4[%c0_5, %c0_6, %c0_7] : memref<1x1x128xf32, #tpu.memory_space<vmem>>, vector<1x1x128xf32>
    %7 = vector.shape_cast %6 : vector<1x1x128xf32> to vector<1x128xf32>
    %cst = arith.constant dense<0.000000e+00> : vector<32xf32>
    %8 = vector.multi_reduction <add>, %3, %cst [1] : vector<32x128xf32> to vector<32xf32>
    %9 = vector.shape_cast %8 : vector<32xf32> to vector<32x1xf32>
    %cst_8 = arith.constant 1.280000e+02 : f32
    %10 = vector.broadcast %cst_8 : f32 to vector<32x1xf32>
    %11 = arith.divf %9, %10 : vector<32x1xf32>
    %12 = vector.broadcast %11 : vector<32x1xf32> to vector<32x128xf32>
    %13 = arith.subf %3, %12 : vector<32x128xf32>
    %14 = arith.mulf %13, %13 : vector<32x128xf32>
    %cst_9 = arith.constant dense<0.000000e+00> : vector<32xf32>
    %15 = vector.multi_reduction <add>, %14, %cst_9 [1] : vector<32x128xf32> to vector<32xf32>
    %16 = vector.shape_cast %15 : vector<32xf32> to vector<32x1xf32>
    %cst_10 = arith.constant 1.280000e+02 : f32
    %17 = vector.broadcast %cst_10 : f32 to vector<32x1xf32>
    %18 = arith.divf %16, %17 : vector<32x1xf32>
    %19 = vector.broadcast %11 : vector<32x1xf32> to vector<32x128xf32>
    %20 = arith.subf %3, %19 : vector<32x128xf32>
    %cst_11 = arith.constant 9.99999974E-6 : f32
    %21 = vector.broadcast %cst_11 : f32 to vector<32x1xf32>
    %22 = arith.addf %18, %21 : vector<32x1xf32>
    %23 = math.rsqrt %22 : vector<32x1xf32>
    %24 = vector.broadcast %23 : vector<32x1xf32> to vector<32x128xf32>
    %25 = arith.mulf %20, %24 : vector<32x128xf32>
    %26 = vector.broadcast %5 : vector<1x128xf32> to vector<32x128xf32>
    %27 = arith.mulf %25, %26 : vector<32x128xf32>
    %28 = vector.broadcast %7 : vector<1x128xf32> to vector<32x128xf32>
    %29 = arith.addf %27, %28 : vector<32x128xf32>
    %30 = arith.truncf %29 : vector<32x128xf32> to vector<32x128xbf16>
    %c0_12 = arith.constant 0 : index
    %c0_13 = arith.constant 0 : index
    %c0_14 = arith.constant 0 : index
    %31 = vector.load %arg5[%c0_12, %c0_13, %c0_14] : memref<1x128x384xbf16, #tpu.memory_space<vmem>>, vector<1x128x384xbf16>
    %32 = vector.shape_cast %31 : vector<1x128x384xbf16> to vector<128x384xbf16>
    %cst_15 = arith.constant dense<0.000000e+00> : vector<32x384xf32>
    %33 = tpu.matmul %30, %32, %cst_15 {dimension_numbers = #tpu.dot_dimension_numbers<[1], [0], [0], [1], [0, 0, 1, 1], [], []>} : vector<32x128xbf16>, vector<128x384xbf16>, vector<32x384xf32> -> vector<32x384xf32>
    %34 = vector.extract_strided_slice %33 {offsets = [0, 0], sizes = [32, 128], strides = [1, 1]} : vector<32x384xf32> to vector<32x128xf32>
    %35 = vector.shape_cast %34 : vector<32x128xf32> to vector<2x16x128xf32>
    %36 = vector.extract_strided_slice %33 {offsets = [0, 128], sizes = [32, 128], strides = [1, 1]} : vector<32x384xf32> to vector<32x128xf32>
    %37 = vector.shape_cast %36 : vector<32x128xf32> to vector<2x16x128xf32>
    %38 = vector.extract_strided_slice %33 {offsets = [0, 256], sizes = [32, 128], strides = [1, 1]} : vector<32x384xf32> to vector<32x128xf32>
    %39 = vector.shape_cast %38 : vector<32x128xf32> to vector<2x16x128xf32>
    %c0_16 = arith.constant 0 : index
    %c0_17 = arith.constant 0 : index
    %c0_18 = arith.constant 0 : index
    %40 = vector.load %arg7[%c0_16, %c0_17, %c0_18] : memref<1x1x128xf32, #tpu.memory_space<vmem>>, vector<1x1x128xf32>
    %41 = vector.shape_cast %40 : vector<1x1x128xf32> to vector<1x128xf32>
    %42 = vector.broadcast %41 : vector<1x128xf32> to vector<32x128xf32>
    %43 = arith.addf %3, %42 : vector<32x128xf32>
    %44 = vector.extract_strided_slice %35 {offsets = [0, 0, 0], sizes = [2, 16, 32], strides = [1, 1, 1]} : vector<2x16x128xf32> to vector<2x16x32xf32>
    %45 = arith.truncf %44 : vector<2x16x32xf32> to vector<2x16x32xbf16>
    %46 = vector.extract_strided_slice %37 {offsets = [0, 0, 0], sizes = [2, 16, 32], strides = [1, 1, 1]} : vector<2x16x128xf32> to vector<2x16x32xf32>
    %47 = arith.truncf %46 : vector<2x16x32xf32> to vector<2x16x32xbf16>
    %48 = vector.extract_strided_slice %39 {offsets = [0, 0, 0], sizes = [2, 16, 32], strides = [1, 1, 1]} : vector<2x16x128xf32> to vector<2x16x32xf32>
    %49 = arith.truncf %48 : vector<2x16x32xf32> to vector<2x16x32xbf16>
    "tpu.trace_start"() <{level = 10 : i32, message = "bnd,bmd->bnm"}> : () -> ()
    %cst_19 = arith.constant dense<0.000000e+00> : vector<2x16x16xf32>
    %50 = tpu.matmul %45, %47, %cst_19 {dimension_numbers = #tpu.dot_dimension_numbers<[2], [2], [1], [1], [0, 0, 0, 1, 1, 1], [0], [0]>} : vector<2x16x32xbf16>, vector<2x16x32xbf16>, vector<2x16x16xf32> -> vector<2x16x16xf32>
    "tpu.trace_stop"() : () -> ()
    %cst_20 = arith.constant dense<0xFF800000> : vector<2x16xf32>
    %51 = vector.multi_reduction <maximumf>, %50, %cst_20 [2] : vector<2x16x16xf32> to vector<2x16xf32>
    %52 = vector.shape_cast %51 : vector<2x16xf32> to vector<2x16x1xf32>
    %53 = vector.broadcast %52 : vector<2x16x1xf32> to vector<2x16x16xf32>
    %54 = arith.subf %50, %53 : vector<2x16x16xf32>
    %55 = math.exp %54 : vector<2x16x16xf32>
    %cst_21 = arith.constant dense<0.000000e+00> : vector<2x16xf32>
    %56 = vector.multi_reduction <add>, %55, %cst_21 [2] : vector<2x16x16xf32> to vector<2x16xf32>
    %57 = vector.shape_cast %56 : vector<2x16xf32> to vector<2x16x1xf32>
    %58 = tpu.reciprocal %57 {approx = true} : vector<2x16x1xf32> -> vector<2x16x1xf32>
    %59 = vector.broadcast %58 : vector<2x16x1xf32> to vector<2x16x16xf32>
    %60 = arith.mulf %55, %59 : vector<2x16x16xf32>
    %61 = arith.truncf %60 : vector<2x16x16xf32> to vector<2x16x16xbf16>
    "tpu.trace_start"() <{level = 10 : i32, message = "bnm,bmd->bnd"}> : () -> ()
    %cst_22 = arith.constant dense<0.000000e+00> : vector<2x16x32xf32>
    %62 = tpu.matmul %61, %49, %cst_22 {dimension_numbers = #tpu.dot_dimension_numbers<[2], [1], [1], [2], [0, 0, 0, 1, 1, 2], [0], [0]>} : vector<2x16x16xbf16>, vector<2x16x32xbf16>, vector<2x16x32xf32> -> vector<2x16x32xf32>
    "tpu.trace_stop"() : () -> ()
    %63 = vector.shape_cast %62 : vector<2x16x32xf32> to vector<32x32xf32>
    %64 = arith.truncf %63 : vector<32x32xf32> to vector<32x32xbf16>
    %c0_23 = arith.constant 0 : index
    %c0_24 = arith.constant 0 : index
    %c0_25 = arith.constant 0 : index
    %c0_26 = arith.constant 0 : index
    %65 = vector.load %arg6[%c0_23, %c0_24, %c0_25, %c0_26] : memref<1x4x32x128xbf16, #tpu.memory_space<vmem>>, vector<1x1x32x128xbf16>
    %66 = vector.shape_cast %65 : vector<1x1x32x128xbf16> to vector<32x128xbf16>
    %cst_27 = arith.constant dense<0.000000e+00> : vector<32x128xf32>
    %67 = tpu.matmul %64, %66, %cst_27 {dimension_numbers = #tpu.dot_dimension_numbers<[1], [0], [0], [1], [0, 0, 1, 1], [], []>} : vector<32x32xbf16>, vector<32x128xbf16>, vector<32x128xf32> -> vector<32x128xf32>
    %68 = arith.addf %43, %67 : vector<32x128xf32>
    %69 = vector.extract_strided_slice %35 {offsets = [0, 0, 32], sizes = [2, 16, 32], strides = [1, 1, 1]} : vector<2x16x128xf32> to vector<2x16x32xf32>
    %70 = arith.truncf %69 : vector<2x16x32xf32> to vector<2x16x32xbf16>
    %71 = vector.extract_strided_slice %37 {offsets = [0, 0, 32], sizes = [2, 16, 32], strides = [1, 1, 1]} : vector<2x16x128xf32> to vector<2x16x32xf32>
    %72 = arith.truncf %71 : vector<2x16x32xf32> to vector<2x16x32xbf16>
    %73 = vector.extract_strided_slice %39 {offsets = [0, 0, 32], sizes = [2, 16, 32], strides = [1, 1, 1]} : vector<2x16x128xf32> to vector<2x16x32xf32>
    %74 = arith.truncf %73 : vector<2x16x32xf32> to vector<2x16x32xbf16>
    "tpu.trace_start"() <{level = 10 : i32, message = "bnd,bmd->bnm"}> : () -> ()
    %cst_28 = arith.constant dense<0.000000e+00> : vector<2x16x16xf32>
    %75 = tpu.matmul %70, %72, %cst_28 {dimension_numbers = #tpu.dot_dimension_numbers<[2], [2], [1], [1], [0, 0, 0, 1, 1, 1], [0], [0]>} : vector<2x16x32xbf16>, vector<2x16x32xbf16>, vector<2x16x16xf32> -> vector<2x16x16xf32>
    "tpu.trace_stop"() : () -> ()
    %cst_29 = arith.constant dense<0xFF800000> : vector<2x16xf32>
    %76 = vector.multi_reduction <maximumf>, %75, %cst_29 [2] : vector<2x16x16xf32> to vector<2x16xf32>
    %77 = vector.shape_cast %76 : vector<2x16xf32> to vector<2x16x1xf32>
    %78 = vector.broadcast %77 : vector<2x16x1xf32> to vector<2x16x16xf32>
    %79 = arith.subf %75, %78 : vector<2x16x16xf32>
    %80 = math.exp %79 : vector<2x16x16xf32>
    %cst_30 = arith.constant dense<0.000000e+00> : vector<2x16xf32>
    %81 = vector.multi_reduction <add>, %80, %cst_30 [2] : vector<2x16x16xf32> to vector<2x16xf32>
    %82 = vector.shape_cast %81 : vector<2x16xf32> to vector<2x16x1xf32>
    %83 = tpu.reciprocal %82 {approx = true} : vector<2x16x1xf32> -> vector<2x16x1xf32>
    %84 = vector.broadcast %83 : vector<2x16x1xf32> to vector<2x16x16xf32>
    %85 = arith.mulf %80, %84 : vector<2x16x16xf32>
    %86 = arith.truncf %85 : vector<2x16x16xf32> to vector<2x16x16xbf16>
    "tpu.trace_start"() <{level = 10 : i32, message = "bnm,bmd->bnd"}> : () -> ()
    %cst_31 = arith.constant dense<0.000000e+00> : vector<2x16x32xf32>
    %87 = tpu.matmul %86, %74, %cst_31 {dimension_numbers = #tpu.dot_dimension_numbers<[2], [1], [1], [2], [0, 0, 0, 1, 1, 2], [0], [0]>} : vector<2x16x16xbf16>, vector<2x16x32xbf16>, vector<2x16x32xf32> -> vector<2x16x32xf32>
    "tpu.trace_stop"() : () -> ()
    %88 = vector.shape_cast %87 : vector<2x16x32xf32> to vector<32x32xf32>
    %89 = arith.truncf %88 : vector<32x32xf32> to vector<32x32xbf16>
    %c0_32 = arith.constant 0 : index
    %c1 = arith.constant 1 : index
    %c0_33 = arith.constant 0 : index
    %c0_34 = arith.constant 0 : index
    %90 = vector.load %arg6[%c0_32, %c1, %c0_33, %c0_34] : memref<1x4x32x128xbf16, #tpu.memory_space<vmem>>, vector<1x1x32x128xbf16>
    %91 = vector.shape_cast %90 : vector<1x1x32x128xbf16> to vector<32x128xbf16>
    %cst_35 = arith.constant dense<0.000000e+00> : vector<32x128xf32>
    %92 = tpu.matmul %89, %91, %cst_35 {dimension_numbers = #tpu.dot_dimension_numbers<[1], [0], [0], [1], [0, 0, 1, 1], [], []>} : vector<32x32xbf16>, vector<32x128xbf16>, vector<32x128xf32> -> vector<32x128xf32>
    %93 = arith.addf %68, %92 : vector<32x128xf32>
    %94 = vector.extract_strided_slice %35 {offsets = [0, 0, 64], sizes = [2, 16, 32], strides = [1, 1, 1]} : vector<2x16x128xf32> to vector<2x16x32xf32>
    %95 = arith.truncf %94 : vector<2x16x32xf32> to vector<2x16x32xbf16>
    %96 = vector.extract_strided_slice %37 {offsets = [0, 0, 64], sizes = [2, 16, 32], strides = [1, 1, 1]} : vector<2x16x128xf32> to vector<2x16x32xf32>
    %97 = arith.truncf %96 : vector<2x16x32xf32> to vector<2x16x32xbf16>
    %98 = vector.extract_strided_slice %39 {offsets = [0, 0, 64], sizes = [2, 16, 32], strides = [1, 1, 1]} : vector<2x16x128xf32> to vector<2x16x32xf32>
    %99 = arith.truncf %98 : vector<2x16x32xf32> to vector<2x16x32xbf16>
    "tpu.trace_start"() <{level = 10 : i32, message = "bnd,bmd->bnm"}> : () -> ()
    %cst_36 = arith.constant dense<0.000000e+00> : vector<2x16x16xf32>
    %100 = tpu.matmul %95, %97, %cst_36 {dimension_numbers = #tpu.dot_dimension_numbers<[2], [2], [1], [1], [0, 0, 0, 1, 1, 1], [0], [0]>} : vector<2x16x32xbf16>, vector<2x16x32xbf16>, vector<2x16x16xf32> -> vector<2x16x16xf32>
    "tpu.trace_stop"() : () -> ()
    %cst_37 = arith.constant dense<0xFF800000> : vector<2x16xf32>
    %101 = vector.multi_reduction <maximumf>, %100, %cst_37 [2] : vector<2x16x16xf32> to vector<2x16xf32>
    %102 = vector.shape_cast %101 : vector<2x16xf32> to vector<2x16x1xf32>
    %103 = vector.broadcast %102 : vector<2x16x1xf32> to vector<2x16x16xf32>
    %104 = arith.subf %100, %103 : vector<2x16x16xf32>
    %105 = math.exp %104 : vector<2x16x16xf32>
    %cst_38 = arith.constant dense<0.000000e+00> : vector<2x16xf32>
    %106 = vector.multi_reduction <add>, %105, %cst_38 [2] : vector<2x16x16xf32> to vector<2x16xf32>
    %107 = vector.shape_cast %106 : vector<2x16xf32> to vector<2x16x1xf32>
    %108 = tpu.reciprocal %107 {approx = true} : vector<2x16x1xf32> -> vector<2x16x1xf32>
    %109 = vector.broadcast %108 : vector<2x16x1xf32> to vector<2x16x16xf32>
    %110 = arith.mulf %105, %109 : vector<2x16x16xf32>
    %111 = arith.truncf %110 : vector<2x16x16xf32> to vector<2x16x16xbf16>
    "tpu.trace_start"() <{level = 10 : i32, message = "bnm,bmd->bnd"}> : () -> ()
    %cst_39 = arith.constant dense<0.000000e+00> : vector<2x16x32xf32>
    %112 = tpu.matmul %111, %99, %cst_39 {dimension_numbers = #tpu.dot_dimension_numbers<[2], [1], [1], [2], [0, 0, 0, 1, 1, 2], [0], [0]>} : vector<2x16x16xbf16>, vector<2x16x32xbf16>, vector<2x16x32xf32> -> vector<2x16x32xf32>
    "tpu.trace_stop"() : () -> ()
    %113 = vector.shape_cast %112 : vector<2x16x32xf32> to vector<32x32xf32>
    %114 = arith.truncf %113 : vector<32x32xf32> to vector<32x32xbf16>
    %c0_40 = arith.constant 0 : index
    %c2 = arith.constant 2 : index
    %c0_41 = arith.constant 0 : index
    %c0_42 = arith.constant 0 : index
    %115 = vector.load %arg6[%c0_40, %c2, %c0_41, %c0_42] : memref<1x4x32x128xbf16, #tpu.memory_space<vmem>>, vector<1x1x32x128xbf16>
    %116 = vector.shape_cast %115 : vector<1x1x32x128xbf16> to vector<32x128xbf16>
    %cst_43 = arith.constant dense<0.000000e+00> : vector<32x128xf32>
    %117 = tpu.matmul %114, %116, %cst_43 {dimension_numbers = #tpu.dot_dimension_numbers<[1], [0], [0], [1], [0, 0, 1, 1], [], []>} : vector<32x32xbf16>, vector<32x128xbf16>, vector<32x128xf32> -> vector<32x128xf32>
    %118 = arith.addf %93, %117 : vector<32x128xf32>
    %119 = vector.extract_strided_slice %35 {offsets = [0, 0, 96], sizes = [2, 16, 32], strides = [1, 1, 1]} : vector<2x16x128xf32> to vector<2x16x32xf32>
    %120 = arith.truncf %119 : vector<2x16x32xf32> to vector<2x16x32xbf16>
    %121 = vector.extract_strided_slice %37 {offsets = [0, 0, 96], sizes = [2, 16, 32], strides = [1, 1, 1]} : vector<2x16x128xf32> to vector<2x16x32xf32>
    %122 = arith.truncf %121 : vector<2x16x32xf32> to vector<2x16x32xbf16>
    %123 = vector.extract_strided_slice %39 {offsets = [0, 0, 96], sizes = [2, 16, 32], strides = [1, 1, 1]} : vector<2x16x128xf32> to vector<2x16x32xf32>
    %124 = arith.truncf %123 : vector<2x16x32xf32> to vector<2x16x32xbf16>
    "tpu.trace_start"() <{level = 10 : i32, message = "bnd,bmd->bnm"}> : () -> ()
    %cst_44 = arith.constant dense<0.000000e+00> : vector<2x16x16xf32>
    %125 = tpu.matmul %120, %122, %cst_44 {dimension_numbers = #tpu.dot_dimension_numbers<[2], [2], [1], [1], [0, 0, 0, 1, 1, 1], [0], [0]>} : vector<2x16x32xbf16>, vector<2x16x32xbf16>, vector<2x16x16xf32> -> vector<2x16x16xf32>
    "tpu.trace_stop"() : () -> ()
    %cst_45 = arith.constant dense<0xFF800000> : vector<2x16xf32>
    %126 = vector.multi_reduction <maximumf>, %125, %cst_45 [2] : vector<2x16x16xf32> to vector<2x16xf32>
    %127 = vector.shape_cast %126 : vector<2x16xf32> to vector<2x16x1xf32>
    %128 = vector.broadcast %127 : vector<2x16x1xf32> to vector<2x16x16xf32>
    %129 = arith.subf %125, %128 : vector<2x16x16xf32>
    %130 = math.exp %129 : vector<2x16x16xf32>
    %cst_46 = arith.constant dense<0.000000e+00> : vector<2x16xf32>
    %131 = vector.multi_reduction <add>, %130, %cst_46 [2] : vector<2x16x16xf32> to vector<2x16xf32>
    %132 = vector.shape_cast %131 : vector<2x16xf32> to vector<2x16x1xf32>
    %133 = tpu.reciprocal %132 {approx = true} : vector<2x16x1xf32> -> vector<2x16x1xf32>
    %134 = vector.broadcast %133 : vector<2x16x1xf32> to vector<2x16x16xf32>
    %135 = arith.mulf %130, %134 : vector<2x16x16xf32>
    %136 = arith.truncf %135 : vector<2x16x16xf32> to vector<2x16x16xbf16>
    "tpu.trace_start"() <{level = 10 : i32, message = "bnm,bmd->bnd"}> : () -> ()
    %cst_47 = arith.constant dense<0.000000e+00> : vector<2x16x32xf32>
    %137 = tpu.matmul %136, %124, %cst_47 {dimension_numbers = #tpu.dot_dimension_numbers<[2], [1], [1], [2], [0, 0, 0, 1, 1, 2], [0], [0]>} : vector<2x16x16xbf16>, vector<2x16x32xbf16>, vector<2x16x32xf32> -> vector<2x16x32xf32>
    "tpu.trace_stop"() : () -> ()
    %138 = vector.shape_cast %137 : vector<2x16x32xf32> to vector<32x32xf32>
    %139 = arith.truncf %138 : vector<32x32xf32> to vector<32x32xbf16>
    %c0_48 = arith.constant 0 : index
    %c3 = arith.constant 3 : index
    %c0_49 = arith.constant 0 : index
    %c0_50 = arith.constant 0 : index
    %140 = vector.load %arg6[%c0_48, %c3, %c0_49, %c0_50] : memref<1x4x32x128xbf16, #tpu.memory_space<vmem>>, vector<1x1x32x128xbf16>
    %141 = vector.shape_cast %140 : vector<1x1x32x128xbf16> to vector<32x128xbf16>
    %cst_51 = arith.constant dense<0.000000e+00> : vector<32x128xf32>
    %142 = tpu.matmul %139, %141, %cst_51 {dimension_numbers = #tpu.dot_dimension_numbers<[1], [0], [0], [1], [0, 0, 1, 1], [], []>} : vector<32x32xbf16>, vector<32x128xbf16>, vector<32x128xf32> -> vector<32x128xf32>
    %143 = arith.addf %118, %142 : vector<32x128xf32>
    %c0_52 = arith.constant 0 : index
    %c0_53 = arith.constant 0 : index
    %c0_54 = arith.constant 0 : index
    %144 = vector.load %arg8[%c0_52, %c0_53, %c0_54] : memref<1x1x128xf32, #tpu.memory_space<vmem>>, vector<1x1x128xf32>
    %145 = vector.shape_cast %144 : vector<1x1x128xf32> to vector<1x128xf32>
    %c0_55 = arith.constant 0 : index
    %c0_56 = arith.constant 0 : index
    %c0_57 = arith.constant 0 : index
    %146 = vector.load %arg9[%c0_55, %c0_56, %c0_57] : memref<1x1x128xf32, #tpu.memory_space<vmem>>, vector<1x1x128xf32>
    %147 = vector.shape_cast %146 : vector<1x1x128xf32> to vector<1x128xf32>
    %cst_58 = arith.constant dense<0.000000e+00> : vector<32xf32>
    %148 = vector.multi_reduction <add>, %143, %cst_58 [1] : vector<32x128xf32> to vector<32xf32>
    %149 = vector.shape_cast %148 : vector<32xf32> to vector<32x1xf32>
    %cst_59 = arith.constant 1.280000e+02 : f32
    %150 = vector.broadcast %cst_59 : f32 to vector<32x1xf32>
    %151 = arith.divf %149, %150 : vector<32x1xf32>
    %152 = vector.broadcast %151 : vector<32x1xf32> to vector<32x128xf32>
    %153 = arith.subf %143, %152 : vector<32x128xf32>
    %154 = arith.mulf %153, %153 : vector<32x128xf32>
    %cst_60 = arith.constant dense<0.000000e+00> : vector<32xf32>
    %155 = vector.multi_reduction <add>, %154, %cst_60 [1] : vector<32x128xf32> to vector<32xf32>
    %156 = vector.shape_cast %155 : vector<32xf32> to vector<32x1xf32>
    %cst_61 = arith.constant 1.280000e+02 : f32
    %157 = vector.broadcast %cst_61 : f32 to vector<32x1xf32>
    %158 = arith.divf %156, %157 : vector<32x1xf32>
    %159 = vector.broadcast %151 : vector<32x1xf32> to vector<32x128xf32>
    %160 = arith.subf %143, %159 : vector<32x128xf32>
    %cst_62 = arith.constant 9.99999974E-6 : f32
    %161 = vector.broadcast %cst_62 : f32 to vector<32x1xf32>
    %162 = arith.addf %158, %161 : vector<32x1xf32>
    %163 = math.rsqrt %162 : vector<32x1xf32>
    %164 = vector.broadcast %163 : vector<32x1xf32> to vector<32x128xf32>
    %165 = arith.mulf %160, %164 : vector<32x128xf32>
    %166 = vector.broadcast %145 : vector<1x128xf32> to vector<32x128xf32>
    %167 = arith.mulf %165, %166 : vector<32x128xf32>
    %168 = vector.broadcast %147 : vector<1x128xf32> to vector<32x128xf32>
    %169 = arith.addf %167, %168 : vector<32x128xf32>
    %170 = arith.truncf %169 : vector<32x128xf32> to vector<32x128xbf16>
    %c0_63 = arith.constant 0 : index
    %c0_64 = arith.constant 0 : index
    %c0_65 = arith.constant 0 : index
    %171 = vector.load %arg10[%c0_63, %c0_64, %c0_65] : memref<1x128x512xbf16, #tpu.memory_space<vmem>>, vector<1x128x512xbf16>
    %172 = vector.shape_cast %171 : vector<1x128x512xbf16> to vector<128x512xbf16>
    %cst_66 = arith.constant dense<0.000000e+00> : vector<32x512xf32>
    %173 = tpu.matmul %170, %172, %cst_66 {dimension_numbers = #tpu.dot_dimension_numbers<[1], [0], [0], [1], [0, 0, 1, 1], [], []>} : vector<32x128xbf16>, vector<128x512xbf16>, vector<32x512xf32> -> vector<32x512xf32>
    %c0_67 = arith.constant 0 : index
    %c0_68 = arith.constant 0 : index
    %c0_69 = arith.constant 0 : index
    %174 = vector.load %arg11[%c0_67, %c0_68, %c0_69] : memref<1x1x512xf32, #tpu.memory_space<vmem>>, vector<1x1x512xf32>
    %175 = vector.shape_cast %174 : vector<1x1x512xf32> to vector<1x512xf32>
    %176 = vector.broadcast %175 : vector<1x512xf32> to vector<32x512xf32>
    %177 = arith.addf %173, %176 : vector<32x512xf32>
    %178 = arith.mulf %177, %177 : vector<32x512xf32>
    %179 = arith.mulf %177, %178 : vector<32x512xf32>
    %cst_70 = arith.constant 4.471500e-02 : f32
    %180 = vector.broadcast %cst_70 : f32 to vector<32x512xf32>
    %181 = arith.mulf %180, %179 : vector<32x512xf32>
    %182 = arith.addf %177, %181 : vector<32x512xf32>
    %cst_71 = arith.constant 0.797884583 : f32
    %183 = vector.broadcast %cst_71 : f32 to vector<32x512xf32>
    %184 = arith.mulf %183, %182 : vector<32x512xf32>
    %185 = math.tanh %184 : vector<32x512xf32>
    %cst_72 = arith.constant 1.000000e+00 : f32
    %186 = vector.broadcast %cst_72 : f32 to vector<32x512xf32>
    %187 = arith.addf %186, %185 : vector<32x512xf32>
    %cst_73 = arith.constant 5.000000e-01 : f32
    %188 = vector.broadcast %cst_73 : f32 to vector<32x512xf32>
    %189 = arith.mulf %188, %187 : vector<32x512xf32>
    %190 = arith.mulf %177, %189 : vector<32x512xf32>
    %191 = arith.truncf %190 : vector<32x512xf32> to vector<32x512xbf16>
    %c0_74 = arith.constant 0 : index
    %c0_75 = arith.constant 0 : index
    %c0_76 = arith.constant 0 : index
    %192 = vector.load %arg12[%c0_74, %c0_75, %c0_76] : memref<1x512x128xbf16, #tpu.memory_space<vmem>>, vector<1x512x128xbf16>
    %193 = vector.shape_cast %192 : vector<1x512x128xbf16> to vector<512x128xbf16>
    %cst_77 = arith.constant dense<0.000000e+00> : vector<32x128xf32>
    %194 = tpu.matmul %191, %193, %cst_77 {dimension_numbers = #tpu.dot_dimension_numbers<[1], [0], [0], [1], [0, 0, 1, 1], [], []>} : vector<32x512xbf16>, vector<512x128xbf16>, vector<32x128xf32> -> vector<32x128xf32>
    %c0_78 = arith.constant 0 : index
    %c0_79 = arith.constant 0 : index
    %c0_80 = arith.constant 0 : index
    %195 = vector.load %arg13[%c0_78, %c0_79, %c0_80] : memref<1x1x128xf32, #tpu.memory_space<vmem>>, vector<1x1x128xf32>
    %196 = vector.shape_cast %195 : vector<1x1x128xf32> to vector<1x128xf32>
    %197 = vector.broadcast %196 : vector<1x128xf32> to vector<32x128xf32>
    %198 = arith.addf %194, %197 : vector<32x128xf32>
    %199 = arith.addf %198, %143 : vector<32x128xf32>
    %c0_81 = arith.constant 0 : index
    %c0_82 = arith.constant 0 : index
    %200 = vector.load %arg15[%c0_81, %c0_82] : memref<32x128xf32, #tpu.memory_space<vmem>>, vector<32x128xf32>
    tpu.vector_store %arg15[%c0_81, %c0_82], %199 {strides = array<i32>} : memref<32x128xf32, #tpu.memory_space<vmem>>, vector<32x128xf32>,
    %c1_i32 = arith.constant 1 : i32
    %201 = arith.cmpi eq, %arg1, %c1_i32 : i32
    %202 = arith.extui %201 : i1 to i32
    %c0_i32_83 = arith.constant 0 : i32
    %203 = arith.cmpi ne, %202, %c0_i32_83 : i32
    scf.if %203 {
      %204 = vector.shape_cast %199 : vector<32x128xf32> to vector<2x16x128xf32>
      %c0_84 = arith.constant 0 : index
      %c0_85 = arith.constant 0 : index
      %c0_86 = arith.constant 0 : index
      %205 = vector.load %arg14[%c0_84, %c0_85, %c0_86] : memref<2x16x128xf32, #tpu.memory_space<vmem>>, vector<2x16x128xf32>
      tpu.vector_store %arg14[%c0_84, %c0_85, %c0_86], %204 {strides = array<i32>} : memref<2x16x128xf32, #tpu.memory_space<vmem>>, vector<2x16x128xf32>,
    } else {
    }
    return
  }
  func.func @transform_0(%arg0: i32, %arg1: i32) -> (i32, i32, i32) {
    %c0_i32 = arith.constant 0 : i32
    %c0_i32_0 = arith.constant 0 : i32
    %c0_i32_1 = arith.constant 0 : i32
    return %arg0, %c0_i32, %c0_i32_0 : i32, i32, i32
  }
  func.func @transform_1(%arg0: i32, %arg1: i32) -> (i32, i32, i32) {
    %c0_i32 = arith.constant 0 : i32
    %c0_i32_0 = arith.constant 0 : i32
    %c0_i32_1 = arith.constant 0 : i32
    return %arg1, %c0_i32, %c0_i32_0 : i32, i32, i32
  }
  func.func @transform_2(%arg0: i32, %arg1: i32) -> (i32, i32, i32) {
    %c0_i32 = arith.constant 0 : i32
    %c0_i32_0 = arith.constant 0 : i32
    %c0_i32_1 = arith.constant 0 : i32
    return %arg1, %c0_i32, %c0_i32_0 : i32, i32, i32
  }
  func.func @transform_3(%arg0: i32, %arg1: i32) -> (i32, i32, i32) {
    %c0_i32 = arith.constant 0 : i32
    %c0_i32_0 = arith.constant 0 : i32
    %c0_i32_1 = arith.constant 0 : i32
    return %arg1, %c0_i32, %c0_i32_0 : i32, i32, i32
  }
  func.func @transform_4(%arg0: i32, %arg1: i32) -> (i32, i32, i32, i32) {
    %c0_i32 = arith.constant 0 : i32
    %c0_i32_0 = arith.constant 0 : i32
    %c0_i32_1 = arith.constant 0 : i32
    %c0_i32_2 = arith.constant 0 : i32
    return %arg1, %c0_i32, %c0_i32_0, %c0_i32_1 : i32, i32, i32, i32
  }
  func.func @transform_5(%arg0: i32, %arg1: i32) -> (i32, i32, i32) {
    %c0_i32 = arith.constant 0 : i32
    %c0_i32_0 = arith.constant 0 : i32
    %c0_i32_1 = arith.constant 0 : i32
    return %arg1, %c0_i32, %c0_i32_0 : i32, i32, i32
  }
  func.func @transform_6(%arg0: i32, %arg1: i32) -> (i32, i32, i32) {
    %c0_i32 = arith.constant 0 : i32
    %c0_i32_0 = arith.constant 0 : i32
    %c0_i32_1 = arith.constant 0 : i32
    return %arg1, %c0_i32, %c0_i32_0 : i32, i32, i32
  }
  func.func @transform_7(%arg0: i32, %arg1: i32) -> (i32, i32, i32) {
    %c0_i32 = arith.constant 0 : i32
    %c0_i32_0 = arith.constant 0 : i32
    %c0_i32_1 = arith.constant 0 : i32
    return %arg1, %c0_i32, %c0_i32_0 : i32, i32, i32
  }
  func.func @transform_8(%arg0: i32, %arg1: i32) -> (i32, i32, i32) {
    %c0_i32 = arith.constant 0 : i32
    %c0_i32_0 = arith.constant 0 : i32
    %c0_i32_1 = arith.constant 0 : i32
    return %arg1, %c0_i32, %c0_i32_0 : i32, i32, i32
  }
  func.func @transform_9(%arg0: i32, %arg1: i32) -> (i32, i32, i32) {
    %c0_i32 = arith.constant 0 : i32
    %c0_i32_0 = arith.constant 0 : i32
    %c0_i32_1 = arith.constant 0 : i32
    return %arg1, %c0_i32, %c0_i32_0 : i32, i32, i32
  }
  func.func @transform_10(%arg0: i32, %arg1: i32) -> (i32, i32, i32) {
    %c0_i32 = arith.constant 0 : i32
    %c0_i32_0 = arith.constant 0 : i32
    %c0_i32_1 = arith.constant 0 : i32
    return %arg1, %c0_i32, %c0_i32_0 : i32, i32, i32
  }
  func.func @transform_11(%arg0: i32, %arg1: i32) -> (i32, i32, i32) {
    %c0_i32 = arith.constant 0 : i32
    %c0_i32_0 = arith.constant 0 : i32
    %c0_i32_1 = arith.constant 0 : i32
    return %arg1, %c0_i32, %c0_i32_0 : i32, i32, i32
  }
  func.func @transform_12(%arg0: i32, %arg1: i32) -> (i32, i32, i32) {
    %c0_i32 = arith.constant 0 : i32
    %c0_i32_0 = arith.constant 0 : i32
    %c0_i32_1 = arith.constant 0 : i32
    return %arg0, %c0_i32, %c0_i32_0 : i32, i32, i32
  }
}

</mosaic_0001>

<bundles_post_ra>
// kernel: encoder_transformer.1
= control target key start
LH: loop header
LB: loop body
LE: loop exit
PB: predicated region body
PF: predicated region fallthrough
CT: control target
= control target key end

     0   :  { %s4816_s0 = inlined_call_operand.vmem [shape: f32[2,16,128], index: 0, kind: input, shape index: {}]   ;;  %s4817_s1 = inlined_call_operand.vmem [shape: f32[2,1,128], index: 1, kind: input, shape index: {}]   ;;  %s4818_s2 = inlined_call_operand.vmem [shape: f32[2,1,128], index: 2, kind: input, shape index: {}]   ;;  %s4819_s3 = inlined_call_operand.vmem [shape: bf16[2,128,384], index: 3, kind: input, shape index: {}]   ;;  %s4820_s4 = inlined_call_operand.vmem [shape: bf16[2,4,32,128], index: 4, kind: input, shape index: {}]   ;;  %s4821_s5 = inlined_call_operand.vmem [shape: f32[2,1,128], index: 5, kind: input, shape index: {}]   ;;  %s4822_s6 = inlined_call_operand.vmem [shape: f32[2,1,128], index: 6, kind: input, shape index: {}]   ;;  %s4823_s7 = inlined_call_operand.vmem [shape: f32[2,1,128], index: 7, kind: input, shape index: {}]   ;;  %s4824_s8 = inlined_call_operand.vmem [shape: bf16[2,128,512], index: 8, kind: input, shape index: {}]   ;;  %s4825_s9 = inlined_call_operand.vmem [shape: f32[2,1,512], index: 9, kind: input, shape index: {}]   ;;  %s4826_s10 = inlined_call_operand.vmem [shape: bf16[2,512,128], index: 10, kind: input, shape index: {}]   ;;  %s4827_s11 = inlined_call_operand.vmem [shape: f32[2,1,128], index: 11, kind: input, shape index: {}]   ;;  %s4828_s12 = inlined_call_operand.hbm [shape: f32[2,16,128], index: 12, kind: output, shape index: {}]  }
   0x1   :  { %4831 = sst [smem:[#allocation9_spill]] %s4820_s4 }
   0x2   :  { %4832 = sst [smem:[#allocation10_spill]] %s4828_s12 }
   0x3   :  { %17 = vsyncpa [#allocation4], 0  ;;  %s4163_s21 = smov 0   ;;  %s4165_s22 = smov 0  }
   0x4   :  { %s4167_s23 = smov 0  }
   0x5 LB: > { %4833 = sst [smem:[#allocation6_spill]] %s4083_s22  ;;  %s32_s25 = sadd.s32 1, %s4083_s22  ;;  %s4087_s23 = sphi %s4167_s23, %s23_s23   ;;  %s4083_s22 = sphi %s4165_s22, %s4847_s22   ;;  %s4079_s21 = sphi %s4163_s21, %s4846_s21  }
   0x6   : > { %4834 = sst [smem:[#allocation7_spill]] %s4087_s23  ;;  %p33_p0 = scmp.ge.s32.totalorder %s32_s25, 2 }
   0x7   : > { %p3343_p1 = scmp.ge.s32.totalorder %s4087_s23, 1  ;;  %p474_p2 = scmp.lt.s32.totalorder %s4087_s23, 3 }
   0x8   : > { %s4849_s25 = smov (%p33_p0, %s32_s25), 0 }
   0x9   : > { %4835 = sst [smem:[#allocation8_spill]] %s4849_s25  ;;  %p475_p3 = pnand %p3343_p1, %p474_p2 }
   0xa   : > { %p561_p4 = scmp.lt.s32.totalorder (!%p475_p3), %s4079_s21, 1  ;;  %s4836_s4 = sld [smem:[#allocation9_spill]] (!%p475_p3) }
   0xb   : > { %478 = sbr.rel (%p475_p3) target bundleno = 4425 (0x1149), region = 68  ;;  %p3352_p5 = scmp.ne.s32.totalorder (!%p475_p3), %s4079_s21, 0 }
  0x10   : > { %s4186_s26 = scalar_select %p561_p4, %s4079_s21, 1 }
  0x12   : > { %s3761_s15 = smul.u32 192, %s4186_s26  ;;  %s3496_s16 = sshll.u32 %s4186_s26, 6 }
  0x13   : > { %s4201_s19 = scalar_lea.vmem %s4836_s4, %s3496_s16  ;;  %s582_s30 = scalar_lea.vmem %s4822_s6, %s4186_s26 }
  0x14   : > { %s4210_s22 = scalar_lea.vmem %s4819_s3, %s3761_s15  ;;  %s3497_s17 = sshll.u32 %s4186_s26, 8 }
  0x15   : > { %s4224_s4 = scalar_lea.vmem %s4824_s8, %s3497_s17  ;;  %s3349_s20 = sshll.u32 %s4186_s26, 2 }
  0x16   : > { %s4230_s24 = scalar_lea.vmem %s4825_s9, %s3349_s20  ;;  %s4235_s12 = scalar_lea.vmem %s4826_s10, %s3497_s17 }
  0x17   : > { %s602_s13 = scalar_lea.vmem %s4827_s11, %s4186_s26  ;;  %608 = sbr.rel (%p3352_p5) target bundleno = 31 (0x1f), region = 72 }
  0x1c   : > { %v609_v0 = vld [vmem:[%s4816_s0] sm:$0xff]  ;;  %v610_v1 = vld [vmem:[%s4816_s0 + $0x8] sm:$0xff]  ;;  %v611_v2 = vld [vmem:[%s4816_s0 + $0x10] sm:$0xff] }
  0x1d   : > { %613 = vst [vmem:[#allocation2 + $0x10] sm:$0xff] %v609_v0  ;;  %614 = vst [vmem:[#allocation2] sm:$0xff] %v610_v1  ;;  %v612_v3 = vld [vmem:[%s4816_s0 + $0x18] sm:$0xff] }
  0x1e   : > { %615 = vst [vmem:[#allocation2 + $0x18] sm:$0xff] %v611_v2  ;;  %616 = vst [vmem:[#allocation2 + $0x8] sm:$0xff] %v612_v3 }
  0x1f PF: > { %v3801_v8 = vld [vmem:[%s4210_s22 + $0xac] ss:$12 sps:$4 sm:$0xff]   ;;  %v3803_v9 = vld [vmem:[%s4210_s22 + $0xa8] ss:$12 sps:$4 sm:$0xff]   ;;  %v3806_v27 = vld [vmem:[%s4210_s22 + $0xb0] ss:$12 sps:$4 sm:$0xff]   ;;  %s4837_s15 = scalar_lea.vmem %s4817_s1, %s4186_s26  ;;  %s4838_s16 = scalar_lea.vmem %s4818_s2, %s4186_s26 }
  0x20   : > { %850 = vmatprep.subr.bf16.mxu0 %v3801_v8  ;;  %v3804_v26 = vld [vmem:[%s4210_s22 + $0x94] ss:$12 sps:$4 sm:$0xff]   ;;  %v3807_v28 = vld [vmem:[%s4210_s22 + $0x90] ss:$12 sps:$4 sm:$0xff]   ;;  %3613 = vmatprep.subr.bf16.mxu1 %v3806_v27  ;;  %v3810_v30 = vld [vmem:[%s4210_s22 + $0x98] ss:$12 sps:$4 sm:$0xff]   ;;  %s4839_s17 = scalar_lea.vmem %s4821_s5, %s4186_s26 }
  0x21   : > { %851 = vmatpush1.bf16.msra.mxu0 %v3803_v9  ;;  %3614 = vmatpush3.bf16.msra.mxu1 %v3806_v27  ;;  %v3808_v29 = vld [vmem:[%s4210_s22 + $0x7c] ss:$12 sps:$4 sm:$0xff]   ;;  %v3811_v31 = vld [vmem:[%s4210_s22 + $0x78] ss:$12 sps:$4 sm:$0xff]   ;;  %v3814_v33 = vld [vmem:[%s4210_s22 + $0x80] ss:$12 sps:$4 sm:$0xff]  }
  0x22   : > { %852 = vmatprep.subr.bf16.mxu0 %v3804_v26  ;;  %3615 = vmatprep.subr.bf16.mxu1 %v3810_v30  ;;  %v3812_v32 = vld [vmem:[%s4210_s22 + $0x64] ss:$12 sps:$4 sm:$0xff]   ;;  %v3815_v34 = vld [vmem:[%s4210_s22 + $0x60] ss:$12 sps:$4 sm:$0xff]   ;;  %v3818_v36 = vld [vmem:[%s4210_s22 + $0x68] ss:$12 sps:$4 sm:$0xff]  }
  0x23   : > { %v3816_v35 = vld [vmem:[%s4210_s22 + $0x4c] ss:$12 sps:$4 sm:$0xff]   ;;  %v3819_v37 = vld [vmem:[%s4210_s22 + $0x48] ss:$12 sps:$4 sm:$0xff]   ;;  %v3822_v39 = vld [vmem:[%s4210_s22 + $0x50] ss:$12 sps:$4 sm:$0xff]  }
  0x24   : > { %v617_v4 = vld [vmem:[#allocation2 + $0x10] sm:$0xff]  ;;  %v618_v6 = vld [vmem:[#allocation2] sm:$0xff]  ;;  %v3824_v41 = vld [vmem:[%s4210_s22 + $0x1c] ss:$12 sps:$4 sm:$0xff]   ;;  %v4089_v43 = vmov 0   ;;  %vm4091_vm0 = vmmov 0  }
  0x25   : > { %v619_v5 = vld [vmem:[#allocation2 + $0x18] sm:$0xff]  ;;  %623 = vadd.xlane.f32.xlu0 %v617_v4  ;;  %v620_v7 = vld [vmem:[#allocation2 + $0x8] sm:$0xff]  ;;  %853 = vmatpush1.bf16.msra.mxu0 %v3807_v28  ;;  %v3820_v38 = vld [vmem:[%s4210_s22 + $0x34] ss:$12 sps:$4 sm:$0xff]   ;;  %vm969_vm1 = vcmask 261120   ;;  %vm1064_vm2 = vcmask 130048  }
  0x26   : > { %627 = vadd.xlane.f32.xlu1 %v619_v5  ;;  %854 = vmatprep.subr.bf16.mxu0 %v3808_v29  ;;  %v3823_v40 = vld [vmem:[%s4210_s22 + $0x30] ss:$12 sps:$4 sm:$0xff]   ;;  %v3826_v42 = vld [vmem:[%s4210_s22 + $0x38] ss:$12 sps:$4 sm:$0xff]   ;;  %v3830_v46 = vld [vmem:[%s4210_s22 + $0x20] ss:$12 sps:$4 sm:$0xff]  }
  0x27   : > { %3616 = vmatpush3.bf16.msra.mxu1 %v3810_v30  ;;  %882 = vmatprep.mubr.bf16.mxu0 %v4089_v43  ;;  %v3827_v44 = vld [vmem:[%s4210_s22 + $0x18] ss:$12 sps:$4 sm:$0xff]   ;;  %v3831_v47 = vld [vmem:[%s4210_s22] ss:$12 sps:$4 sm:$0xff]   ;;  %v3832_v48 = vld [vmem:[%s4210_s22 + $0x8] ss:$12 sps:$4 sm:$0xff]  }
  0x28   : > { %3617 = vmatprep.subr.bf16.mxu1 %v3814_v33  ;;  %v3828_v45 = vld [vmem:[%s4210_s22 + $0x4] ss:$12 sps:$4 sm:$0xff]   ;;  %v3353_v63 = vld [vmem:[%s4837_s15] ss:$0 sm:$0xff]  ;;  %s4092_s18 = smov 96   ;;  %s4093_s28 = smov 64  }
  0x29   : > { %625 = vadd.xlane.f32.xlu0 %v618_v6  ;;  %855 = vmatpush1.bf16.msra.mxu0 %v3811_v31  ;;  %s4094_s25 = smov 32   ;;  %s4840_s15 = scalar_lea.vmem %s4823_s7, %s4186_s26 }
  0x2a   : > { %629 = vadd.xlane.f32.xlu1 %v620_v7  ;;  %856 = vmatprep.subr.bf16.mxu0 %v3812_v32  ;;  %p3491_p6 = scmp.ne.s32.totalorder %s4079_s21, 1 }
  0x2b   : > { %3618 = vmatpush3.bf16.msra.mxu1 %v3814_v33 }
  0x2c   : > { %3619 = vmatprep.subr.bf16.mxu1 %v3818_v36 }
  0x2d   : > { %857 = vmatpush1.bf16.msra.mxu0 %v3815_v34 }
  0x2e   : > { %858 = vmatprep.subr.bf16.mxu0 %v3816_v35 }
  0x2f   : > { %3620 = vmatpush3.bf16.msra.mxu1 %v3818_v36 }
  0x30   : > { %3621 = vmatprep.subr.bf16.mxu1 %v3822_v39 }
  0x31   : > { %859 = vmatpush1.bf16.msra.mxu0 %v3819_v37 }
  0x32   : > { %860 = vmatprep.subr.bf16.mxu0 %v3820_v38 }
  0x33   : > { %3622 = vmatpush3.bf16.msra.mxu1 %v3822_v39 }
  0x34   : > { %3623 = vmatprep.subr.bf16.mxu1 %v3826_v42 }
  0x35   : > { %861 = vmatpush1.bf16.msra.mxu0 %v3823_v40 }
  0x36   : > { %862 = vmatprep.subr.bf16.mxu0 %v3824_v41 }
  0x37   : > { %3624 = vmatpush3.bf16.msra.mxu1 %v3826_v42 }
  0x38   : > { %3625 = vmatprep.subr.bf16.mxu1 %v3830_v46 }
  0x39   : > { %863 = vmatpush1.bf16.msra.mxu0 %v3827_v44 }
  0x3a   : > { %864 = vmatprep.subr.bf16.mxu0 %v3828_v45 }
  0x3b   : > { %3626 = vmatpush3.bf16.msra.mxu1 %v3830_v46 }
  0x3c   : > { %3627 = vmatprep.subr.bf16.mxu1 %v3832_v48 }
  0x3d   : > { %865 = vmatpush1.bf16.msra.mxu0 %v3831_v47 }
  0x3f   : > { %3628 = vmatpush3.bf16.msra.mxu1 %v3832_v48 }
  0xae   : > { %v624_v10 = vpop.xlane.xlu0 %623 }
  0xaf   : > { %v628_v11 = vpop.xlane.xlu1 %627  ;;  %v632_v12 = vmul.f32 0.0078125, %v624_v10 }
  0xb0   : > { %v634_v13 = vmul.f32 0.0078125, %v628_v11 }
  0xb1   : > { %v4256_v14 = vsub.f32 %v617_v4, %v632_v12  ;;  %v3354_v4 = vld [vmem:[%s4838_s16] ss:$0 sm:$0xff] }
  0xb2   : > { %v4258_v15 = vsub.f32 %v619_v5, %v634_v13  ;;  %v626_v16 = vpop.xlane.xlu0 %625 }
  0xb3   : > { %v630_v17 = vpop.xlane.xlu1 %629  ;;  %v633_v18 = vmul.f32 0.0078125, %v626_v16  ;;  %v640_v19 = vmul.f32 %v4256_v14, %v4256_v14 }
  0xb4   : > { %v635_v20 = vmul.f32 0.0078125, %v630_v17  ;;  %v642_v23 = vmul.f32 %v4258_v15, %v4258_v15 }
  0xb5   : > { %v4262_v21 = vsub.f32 %v618_v6, %v633_v18  ;;  %644 = vadd.xlane.f32.xlu0 %v640_v19  ;;  %v4090_v18 = vmov 0.0  }
  0xb6   : > { %v4264_v22 = vsub.f32 %v620_v7, %v635_v20  ;;  %3633 = vmatprep.subr.bf16.mxu1 %v4090_v18  ;;  %3639 = vmatprep.subr.bf16.mxu0 %v4090_v18 }
  0xb7   : > { %v641_v24 = vmul.f32 %v4262_v21, %v4262_v21 }
  0xb8   : > { %v643_v25 = vmul.f32 %v4264_v22, %v4264_v22 }
  0xb9   : > { %648 = vadd.xlane.f32.xlu0 %v642_v23  ;;  %646 = vadd.xlane.f32.xlu1 %v641_v24 }
  0xbd   : > { %650 = vadd.xlane.f32.xlu1 %v643_v25 }
 0x13e   : > { %v645_v49 = vpop.xlane.xlu0 %644 }
 0x13f   : > { %v652_v50 = vmul.f32 0.0078125, %v645_v49 }
 0x141   : > { %v656_v51 = vadd.f32 1e-05, %v652_v50 }
 0x142   : > { %v647_v52 = vpop.xlane.xlu1 %646  ;;  %v649_v53 = vpop.xlane.xlu0 %648 }
 0x143   : > { %3921 = vrsqrt.f32 %v656_v51  ;;  %v653_v54 = vmul.f32 0.0078125, %v647_v52  ;;  %v654_v55 = vmul.f32 0.0078125, %v649_v53 }
 0x145   : > { %v657_v56 = vadd.f32 1e-05, %v653_v54  ;;  %v658_v57 = vadd.f32 1e-05, %v654_v55 }
 0x146   : > { %v651_v58 = vpop.xlane.xlu1 %650 }
 0x147   : > { %3923 = vrsqrt.f32 %v657_v56  ;;  %v655_v59 = vmul.f32 0.0078125, %v651_v58 }
 0x148   : > { %3925 = vrsqrt.f32 %v658_v57 }
 0x149   : > { %v659_v60 = vadd.f32 1e-05, %v655_v59 }
 0x14b   : > { %3927 = vrsqrt.f32 %v659_v60 }
 0x150   : > { %v3922_v61 = vpop.eup %3921 }
 0x151   : > { %v664_v62 = vmul.f32 %v3922_v61, %v4256_v14 }
 0x153   : > { %v674_v3 = vmul.f32 %v3353_v63, %v664_v62 }
 0x154   : > { %v3924_v0 = vpop.eup %3923 }
 0x155   : > { %v3926_v1 = vpop.eup %3925  ;;  %v665_v2 = vmul.f32 %v3924_v0, %v4262_v21  ;;  %v684_v8 = vadd.f32 %v3354_v4, %v674_v3 }
 0x156   : > { %v666_v5 = vmul.f32 %v3926_v1, %v4258_v15 }
 0x157   : > { %v675_v6 = vmul.f32 %v3353_v63, %v665_v2 }
 0x158   : > { %v3928_v7 = vpop.eup %3927  ;;  %v676_v11 = vmul.f32 %v3353_v63, %v666_v5 }
 0x159   : > { %v685_v9 = vadd.f32 %v3354_v4, %v675_v6  ;;  %v667_v10 = vmul.f32 %v3928_v7, %v4264_v22 }
 0x15a   : > { %v686_v14 = vadd.f32 %v3354_v4, %v676_v11 }
 0x15b   : > { %v688_v12 = vpack.c.bf16 %v685_v9, %v684_v8  ;;  %v677_v13 = vmul.f32 %v3353_v63, %v667_v10 }
 0x15d   : > { %883 = vmatmul.mubr.bf16.vlgmr.msra.gmra.mxu0 %v688_v12  ;;  %3629 = vmatprep.mubr.bf16.mxu1 %v688_v12  ;;  %v687_v16 = vadd.f32 %v3354_v4, %v677_v13 }
 0x15e   : > { %892 = vmatprep.mubr.bf16.mxu0 %v4089_v43 }
 0x15f   : > { %v689_v17 = vpack.c.bf16 %v687_v16, %v686_v14 }
 0x161   : > { %3630 = vmatmul.mubr.bf16.vlgmr.msra.gmra.mxu1 %v689_v17 }
 0x162   : > { %3635 = vmatprep.mubr.msk.bf16.mxu1 %vm4091_vm0, %v4090_v18 }
 0x165   : > { %893 = vmatmul.mubr.bf16.gmra.mxu0 %v689_v17 }
 0x166   : > { %3641 = vmatprep.mubr.msk.bf16.mxu0 %vm4091_vm0, %v4090_v18 }
 0x21d   : > { %v884_v15 = vpop.f32.mrf.mxu0 }
 0x21f   : > { %v886_v19 = vpop.f32.mrf.mxu0 }
 0x221   : > { %v888_v20 = vpop.f32.mrf.mxu0  ;;  %v3631_v21 = vpop.f32.mrf.mxu1 }
 0x222   : > { %v4321_v32 = vpack.c.bf16 %v888_v20, %v884_v15 }
 0x223   : > { %v890_v22 = vpop.f32.mrf.mxu0  ;;  %v937_v23 = vpop.f32.mrf.mxu1 }
 0x224   : > { %v4316_v24 = vpack.c.bf16 %v890_v22, %v886_v19 }
 0x225   : > { %v894_v25 = vpop.f32.mrf.mxu0  ;;  %v3632_v26 = vpop.f32.mrf.mxu1 }
 0x226   : > { %v974_v27 = vsel %vm969_vm1, %v4316_v24, 0  ;;  %v4337_v37 = vpack.c.bf16 %v3632_v26, %v3631_v21 }
 0x227   : > { %v896_v28 = vpop.f32.mrf.mxu0  ;;  %3634 = vmatpush3.bf16.xpose.msra.mxu1 %v974_v27  ;;  %v940_v30 = vpop.f32.mrf.mxu1  ;;  %v3833_v27 = vld [vmem:[%s4201_s19 + $0x8] sm:$0xff]  }
 0x228   : > { %3645 = vmatprep.subr.bf16.mxu1 %v4090_v18  ;;  %v4325_v34 = vpack.c.bf16 %v940_v30, %v937_v23 }
 0x229   : > { %v898_v29 = vpop.f32.mrf.mxu0 }
 0x22a   : > { %v4335_v36 = vpack.c.bf16 %v898_v29, %v894_v25 }
 0x22b   : > { %v900_v31 = vpop.f32.mrf.mxu0 }
 0x22c   : > { %v4323_v33 = vpack.c.bf16 %v900_v31, %v896_v28  ;;  %v3834_v28 = vld [vmem:[%s4201_s19] sm:$0xff]  }
 0x22e   : > { %3636 = vmatmul.mubr.msk.bf16.vlgmr.msra.gmra.mxu1 %vm969_vm1, %v4321_v32  ;;  %v1021_v35 = vsel %vm969_vm1, %v4323_v33, 0 }
 0x22f   : > { %3640 = vmatpush3.bf16.xpose.msra.mxu0 %v1021_v35  ;;  %3646 = vmatpush3.bf16.msra.mxu1 %v4325_v34 }
 0x230   : > { %3651 = vmatprep.subr.bf16.mxu0 %v4090_v18  ;;  %3647 = vmatprep.mubr.msk.bf16.mxu1 %vm4091_vm0, %v4090_v18 }
 0x231   : > { %3657 = vmatprep.subr.bf16.mxu1 %v3833_v27 }
 0x236   : > { %3642 = vmatmul.mubr.msk.bf16.vlgmr.msra.gmra.mxu0 %vm969_vm1, %v4335_v36 }
 0x237   : > { %3652 = vmatpush3.bf16.msra.mxu0 %v4337_v37  ;;  %3653 = vmatprep.mubr.msk.bf16.mxu0 %vm4091_vm0, %v4090_v18 }
 0x238   : > { %3665 = vmatprep.subr.bf16.mxu0 %v4090_v18 }
 0x2ee   : > { %v1010_v38 = vpop.f32.mrf.mxu1 }
 0x2ef   : > { %v1065_v39 = vsel %vm1064_vm2, %v1010_v38, -inf }
 0x2f0   : > { %1066 = vmax.xlane.f32.xlu0 %v1065_v39  ;;  %v3637_v40 = vpop.f32.mrf.mxu1 }
 0x2f2   : > { %v1013_v41 = vpop.f32.mrf.mxu1 }
 0x2f3   : > { %v1068_v42 = vsel %vm1064_vm2, %v1013_v41, -inf }
 0x2f4   : > { %1069 = vmax.xlane.f32.xlu1 %v1068_v42  ;;  %v3638_v44 = vpop.f32.mrf.mxu1 }
 0x2f6   : > { %v1057_v45 = vpop.f32.mrf.mxu0 }
 0x2f7   : > { %v1071_v46 = vsel %vm1064_vm2, %v1057_v45, -inf }
 0x2f8   : > { %1072 = vmax.xlane.f32.xlu0 %v1071_v46  ;;  %v3643_v47 = vpop.f32.mrf.mxu0 }
 0x2fa   : > { %v1060_v48 = vpop.f32.mrf.mxu0 }
 0x2fb   : > { %v1074_v49 = vsel %vm1064_vm2, %v1060_v48, -inf }
 0x2fc   : > { %1075 = vmax.xlane.f32.xlu1 %v1074_v49  ;;  %v3644_v50 = vpop.f32.mrf.mxu0 }
 0x379   : > { %v1067_v51 = vpop.xlane.xlu0 %1066 }
 0x37a   : > { %v1077_v52 = vsub.f32 %v1010_v38, %v1067_v51 }
 0x37c   : > { %v1081_v53 = vmul.f32 1.442695, %v1077_v52 }
 0x37d   : > { %v1070_v54 = vpop.xlane.xlu1 %1069 }
 0x37e   : > { %3929 = vpow2.f32 %v1081_v53  ;;  %v1078_v55 = vsub.f32 %v1013_v41, %v1070_v54 }
 0x380   : > { %v1083_v56 = vmul.f32 1.442695, %v1078_v55 }
 0x381   : > { %v1073_v57 = vpop.xlane.xlu0 %1072 }
 0x382   : > { %3931 = vpow2.f32 %v1083_v56  ;;  %v1079_v58 = vsub.f32 %v1057_v45, %v1073_v57 }
 0x384   : > { %v1085_v59 = vmul.f32 1.442695, %v1079_v58 }
 0x385   : > { %v1076_v60 = vpop.xlane.xlu1 %1075 }
 0x386   : > { %3933 = vpow2.f32 %v1085_v59  ;;  %v1080_v61 = vsub.f32 %v1060_v48, %v1076_v60 }
 0x388   : > { %v1087_v62 = vmul.f32 1.442695, %v1080_v61 }
 0x38a   : > { %3935 = vpow2.f32 %v1087_v62 }
 0x38b   : > { %v3930_v63 = vpop.eup %3929 }
 0x38c   : > { %v1089_v0 = vsel %vm1064_vm2, %v3930_v63, 0.0 }
 0x38d   : > { %1090 = vadd.xlane.f32.xlu0 %v1089_v0 }
 0x38f   : > { %v3932_v1 = vpop.eup %3931 }
 0x390   : > { %v1092_v2 = vsel %vm1064_vm2, %v3932_v1, 0.0 }
 0x391   : > { %1093 = vadd.xlane.f32.xlu1 %v1092_v2 }
 0x393   : > { %v3934_v3 = vpop.eup %3933 }
 0x394   : > { %v1095_v4 = vsel %vm1064_vm2, %v3934_v3, 0.0 }
 0x395   : > { %1096 = vadd.xlane.f32.xlu0 %v1095_v4 }
 0x397   : > { %v3936_v5 = vpop.eup %3935 }
 0x398   : > { %v1098_v6 = vsel %vm1064_vm2, %v3936_v5, 0.0 }
 0x399   : > { %1099 = vadd.xlane.f32.xlu1 %v1098_v6 }
 0x3aa   : > { %1333 = vrot.lane.b32.xlu1 %v4323_v33, %s4092_s18 }
 0x3ab   : > { %1280 = vrot.lane.b32.xlu0 %v4316_v24, %s4092_s18 }
 0x3ae   : > { %1277 = vrot.lane.b32.xlu1 %v4321_v32, %s4092_s18 }
 0x3b2   : > { %1330 = vrot.lane.b32.xlu1 %v4335_v36, %s4092_s18 }
 0x416   : > { %v1091_v7 = vpop.xlane.xlu0 %1090 }
 0x417   : > { %3937 = vrcp.f32 %v1091_v7 }
 0x41a   : > { %v1094_v8 = vpop.xlane.xlu1 %1093 }
 0x41b   : > { %3939 = vrcp.f32 %v1094_v8 }
 0x41e   : > { %v1097_v9 = vpop.xlane.xlu0 %1096 }
 0x41f   : > { %3941 = vrcp.f32 %v1097_v9 }
 0x422   : > { %v1100_v10 = vpop.xlane.xlu1 %1099  ;;  %v1281_v21 = vpop.permute.xlu0 %1280 }
 0x423   : > { %3943 = vrcp.f32 %v1100_v10  ;;  %v1286_v23 = vsel %vm969_vm1, %v1281_v21, 0 }
 0x424   : > { %v3938_v11 = vpop.eup %3937 }
 0x425   : > { %v1105_v13 = vmul.f32 %v3938_v11, %v3930_v63 }
 0x426   : > { %v1334_v25 = vpop.permute.xlu1 %1333 }
 0x427   : > { %v1339_v45 = vsel %vm969_vm1, %v1334_v25, 0 }
 0x428   : > { %v3940_v12 = vpop.eup %3939 }
 0x429   : > { %v1106_v14 = vmul.f32 %v3940_v12, %v3932_v1 }
 0x42a   : > { %v1278_v26 = vpop.permute.xlu1 %1277 }
 0x42b   : > { %v1109_v16 = vpack.c.bf16 %v1106_v14, %v1105_v13 }
 0x42c   : > { %v3942_v17 = vpop.eup %3941 }
 0x42d   : > { %3648 = vmatmul.mubr.msk.bf16.vlgmr.msra.gmra.mxu1 %vm1064_vm2, %v1109_v16  ;;  %v1107_v19 = vmul.f32 %v3942_v17, %v3934_v3 }
 0x42e   : > { %3658 = vmatpush3.bf16.msra.mxu1 %v3833_v27  ;;  %v1331_v51 = vpop.permute.xlu1 %1330 }
 0x42f   : > { %3659 = vmatprep.subr.bf16.mxu1 %v3834_v28 }
 0x430   : > { %v3944_v15 = vpop.eup %3943 }
 0x431   : > { %v1108_v20 = vmul.f32 %v3944_v15, %v3936_v5 }
 0x432   : > { %3660 = vmatpush3.bf16.msra.mxu1 %v3834_v28 }
 0x433   : > { %v1110_v22 = vpack.c.bf16 %v1108_v20, %v1107_v19  ;;  %3671 = vmatprep.subr.bf16.mxu1 %v4090_v18 }
 0x435   : > { %3654 = vmatmul.mubr.msk.bf16.vlgmr.msra.gmra.mxu0 %vm1064_vm2, %v1110_v22 }
 0x436   : > { %3666 = vmatpush3.bf16.xpose.msra.mxu0 %v1286_v23  ;;  %3667 = vmatprep.mubr.msk.bf16.mxu0 %vm4091_vm0, %v4090_v18 }
 0x437   : > { %3677 = vmatprep.subr.bf16.mxu0 %v4090_v18 }
 0x43d   : > { %3668 = vmatmul.mubr.msk.bf16.vlgmr.msra.gmra.mxu0 %vm969_vm1, %v1278_v26 }
 0x43e   : > { %3679 = vmatprep.mubr.msk.bf16.mxu0 %vm4091_vm0, %v4090_v18 }
 0x4ed   : > { %v1148_v29 = vpop.f32.mrf.mxu1 }
 0x4ef   : > { %v3649_v30 = vpop.f32.mrf.mxu1 }
 0x4f1   : > { %v1151_v31 = vpop.f32.mrf.mxu1 }
 0x4f2   : > { %v1199_v35 = vpack.c.bf16 %v1151_v31, %v1148_v29 }
 0x4f3   : > { %v3650_v38 = vpop.f32.mrf.mxu1 }
 0x4f4   : > { %3661 = vmatprep.mubr.msk.bf16.mxu1 %vm969_vm1, %v1199_v35 }
 0x4f5   : > { %v1192_v39 = vpop.f32.mrf.mxu0 }
 0x4f7   : > { %v3655_v40 = vpop.f32.mrf.mxu0 }
 0x4f9   : > { %v1195_v41 = vpop.f32.mrf.mxu0 }
 0x4fa   : > { %v1200_v42 = vpack.c.bf16 %v1195_v41, %v1192_v39 }
 0x4fb   : > { %v3656_v44 = vpop.f32.mrf.mxu0 }
 0x4fc   : > { %3662 = vmatmul.mubr.msk.bf16.vlgmr.msra.gmra.mxu1 %vm969_vm1, %v1200_v42 }
 0x4fd   : > { %3672 = vmatpush3.bf16.xpose.msra.mxu1 %v1339_v45  ;;  %v1322_v46 = vpop.f32.mrf.mxu0  ;;  %3673 = vmatprep.mubr.msk.bf16.mxu1 %vm4091_vm0, %v4090_v18 }
 0x4fe   : > { %v1382_v47 = vsel %vm1064_vm2, %v1322_v46, -inf  ;;  %3683 = vmatprep.subr.bf16.mxu1 %v4090_v18 }
 0x4ff   : > { %1383 = vmax.xlane.f32.xlu0 %v1382_v47  ;;  %v3669_v48 = vpop.f32.mrf.mxu0  ;;  %v3836_v47 = vld [vmem:[%s4201_s19 + $0x10] sm:$0xff]  }
 0x501   : > { %v1325_v49 = vpop.f32.mrf.mxu0 }
 0x502   : > { %v1385_v50 = vsel %vm1064_vm2, %v1325_v49, -inf }
 0x503   : > { %1386 = vmax.xlane.f32.xlu1 %v1385_v50  ;;  %v3670_v52 = vpop.f32.mrf.mxu0 }
 0x504   : > { %3674 = vmatmul.mubr.msk.bf16.vlgmr.msra.gmra.mxu1 %vm969_vm1, %v1331_v51 }
 0x505   : > { %3685 = vmatprep.mubr.msk.bf16.mxu1 %vm4091_vm0, %v4090_v18 }
 0x588   : > { %v1384_v58 = vpop.xlane.xlu0 %1383 }
 0x589   : > { %v1394_v59 = vsub.f32 %v1322_v46, %v1384_v58  ;;  %v3835_v46 = vld [vmem:[%s4201_s19 + $0x18] sm:$0xff]  }
 0x58b   : > { %v1398_v60 = vmul.f32 1.442695, %v1394_v59 }
 0x58c   : > { %v1387_v53 = vpop.xlane.xlu1 %1386 }
 0x58d   : > { %v1395_v54 = vsub.f32 %v1325_v49, %v1387_v53 }
 0x58f   : > { %v1400_v55 = vmul.f32 1.442695, %v1395_v54 }
 0x591   : > { %3945 = vpow2.f32 %v1400_v55 }
 0x592   : > { %3947 = vpow2.f32 %v1398_v60 }
 0x59e   : > { %v3946_v56 = vpop.eup %3945 }
 0x59f   : > { %v1409_v57 = vsel %vm1064_vm2, %v3946_v56, 0.0  ;;  %v3948_v6 = vpop.eup %3947 }
 0x5a0   : > { %1410 = vadd.xlane.f32.xlu1 %v1409_v57  ;;  %v1406_v8 = vsel %vm1064_vm2, %v3948_v6, 0.0 }
 0x5bc   : > { %v4385_v61 = vpop.f32.mrf.mxu1 }
 0x5be   : > { %v4387_v62 = vpop.f32.mrf.mxu1 }
 0x5c0   : > { %v4389_v63 = vpop.f32.mrf.mxu1 }
 0x5c2   : > { %v4391_v0 = vpop.f32.mrf.mxu1 }
 0x5c4   : > { %v1375_v1 = vpop.f32.mrf.mxu1 }
 0x5c5   : > { %v1388_v2 = vsel %vm1064_vm2, %v1375_v1, -inf }
 0x5c6   : > { %v3675_v3 = vpop.f32.mrf.mxu1  ;;  %1389 = vmax.xlane.f32.xlu0 %v1388_v2 }
 0x5c8   : > { %v1378_v4 = vpop.f32.mrf.mxu1 }
 0x5c9   : > { %v1391_v5 = vsel %vm1064_vm2, %v1378_v4, -inf }
 0x5ca   : > { %v3676_v7 = vpop.f32.mrf.mxu1  ;;  %1392 = vmax.xlane.f32.xlu0 %v1391_v5 }
 0x5ce   : > { %1407 = vadd.xlane.f32.xlu0 %v1406_v8 }
 0x629   : > { %v1411_v21 = vpop.xlane.xlu1 %1410 }
 0x64f   : > { %v1390_v9 = vpop.xlane.xlu0 %1389 }
 0x650   : > { %v1396_v10 = vsub.f32 %v1375_v1, %v1390_v9 }
 0x652   : > { %v1402_v11 = vmul.f32 1.442695, %v1396_v10 }
 0x653   : > { %v1393_v12 = vpop.xlane.xlu0 %1392 }
 0x654   : > { %3949 = vpow2.f32 %v1402_v11  ;;  %v1397_v13 = vsub.f32 %v1378_v4, %v1393_v12 }
 0x656   : > { %v1404_v14 = vmul.f32 1.442695, %v1397_v13  ;;  %v3379_v13 = vld [vmem:[%s4839_s17] ss:$0 sm:$0xff] }
 0x657   : > { %v1408_v20 = vpop.xlane.xlu0 %1407 }
 0x658   : > { %3951 = vpow2.f32 %v1404_v14 }
 0x659   : > { %3953 = vrcp.f32 %v1408_v20 }
 0x65a   : > { %3955 = vrcp.f32 %v1411_v21 }
 0x661   : > { %v3950_v16 = vpop.eup %3949 }
 0x662   : > { %v1412_v17 = vsel %vm1064_vm2, %v3950_v16, 0.0 }
 0x663   : > { %1413 = vadd.xlane.f32.xlu0 %v1412_v17 }
 0x665   : > { %v3952_v15 = vpop.eup %3951 }
 0x666   : > { %v1415_v19 = vsel %vm1064_vm2, %v3952_v15, 0.0  ;;  %v3954_v22 = vpop.eup %3953 }
 0x667   : > { %1416 = vadd.xlane.f32.xlu1 %v1415_v19  ;;  %v3956_v25 = vpop.eup %3955  ;;  %v1422_v26 = vmul.f32 %v3954_v22, %v3948_v6  ;;  %v4035_v22 = vld [vmem:[#allocation2 + $0x8] sm:$0xff] }
 0x668   : > { %v1423_v29 = vmul.f32 %v3956_v25, %v3946_v56 }
 0x66a   : > { %v1426_v30 = vpack.c.bf16 %v1423_v29, %v1422_v26 }
 0x678   : > { %1477 = vrot.lane.b32.xlu1 %v4337_v37, %s4092_s18 }
 0x679   : > { %1429 = vrot.lane.b32.xlu0 %v4325_v34, %s4092_s18 }
 0x67c   : > { %1604 = vrot.lane.b32.xlu1 %v4316_v24, %s4093_s28 }
 0x67d   : > { %1602 = vrot.lane.b32.xlu0 %v4321_v32, %s4093_s28 }
 0x680   : > { %1655 = vrot.lane.b32.xlu1 %v4323_v33, %s4093_s28 }
 0x684   : > { %1653 = vrot.lane.b32.xlu1 %v4335_v36, %s4093_s28 }
 0x6ec   : > { %v1414_v23 = vpop.xlane.xlu0 %1413 }
 0x6ed   : > { %3957 = vrcp.f32 %v1414_v23  ;;  %v962_v23 = vadd.f32 %v4035_v22, %v3379_v13 }
 0x6f0   : > { %v1430_v27 = vpop.permute.xlu0 %1429  ;;  %v1417_v28 = vpop.xlane.xlu1 %1416 }
 0x6f1   : > { %3959 = vrcp.f32 %v1417_v28  ;;  %3678 = vmatpush3.bf16.msra.mxu0 %v1430_v27  ;;  %v4036_v27 = vld [vmem:[#allocation2] sm:$0xff] }
 0x6f2   : > { %3689 = vmatprep.subr.bf16.mxu0 %v3835_v46  ;;  %v960_v28 = vadd.f32 %v4036_v27, %v3379_v13 }
 0x6f4   : > { %3680 = vmatmul.mubr.msk.bf16.vlgmr.msra.gmra.mxu0 %vm1064_vm2, %v1426_v30  ;;  %v1478_v31 = vpop.permute.xlu1 %1477  ;;  %v1603_v45 = vpop.permute.xlu0 %1602 }
 0x6f5   : > { %3684 = vmatpush3.bf16.msra.mxu1 %v1478_v31  ;;  %3690 = vmatpush3.bf16.msra.mxu0 %v3835_v46  ;;  %v1275_v31 = vadd.f32 %v4389_v63, %v962_v23 }
 0x6f6   : > { %3697 = vmatprep.subr.bf16.mxu1 %v4090_v18  ;;  %3691 = vmatprep.subr.bf16.mxu0 %v3836_v47 }
 0x6f8   : > { %v1605_v41 = vpop.permute.xlu1 %1604 }
 0x6f9   : > { %v1610_v44 = vsel %vm969_vm1, %v1605_v41, 0  ;;  %3692 = vmatpush3.bf16.msra.mxu0 %v3836_v47 }
 0x6fa   : > { %v3958_v35 = vpop.eup %3957  ;;  %3703 = vmatprep.subr.bf16.mxu0 %v4090_v18 }
 0x6fb   : > { %v1424_v39 = vmul.f32 %v3958_v35, %v3950_v16  ;;  %v4033_v16 = vld [vmem:[#allocation2 + $0x18] sm:$0xff] }
 0x6fc   : > { %v1656_v55 = vpop.permute.xlu1 %1655  ;;  %v961_v17 = vadd.f32 %v4033_v16, %v3379_v13 }
 0x6fd   : > { %v1661_v59 = vsel %vm969_vm1, %v1656_v55, 0 }
 0x6fe   : > { %v3960_v38 = vpop.eup %3959  ;;  %v1274_v21 = vadd.f32 %v4385_v61, %v961_v17 }
 0x6ff   : > { %v1425_v40 = vmul.f32 %v3960_v38, %v3952_v15  ;;  %v4034_v15 = vld [vmem:[#allocation2 + $0x10] sm:$0xff] }
 0x700   : > { %v1654_v5 = vpop.permute.xlu1 %1653  ;;  %v959_v19 = vadd.f32 %v4034_v15, %v3379_v13  ;;  %v3837_v13 = vld [vmem:[%s4201_s19 + $0x28] sm:$0xff]  }
 0x701   : > { %v1427_v42 = vpack.c.bf16 %v1425_v40, %v1424_v39  ;;  %v1273_v39 = vadd.f32 %v4391_v0, %v960_v28 }
 0x702   : > { %v1272_v26 = vadd.f32 %v4387_v62, %v959_v19 }
 0x703   : > { %3686 = vmatmul.mubr.msk.bf16.vlgmr.msra.gmra.mxu1 %vm1064_vm2, %v1427_v42 }
 0x704   : > { %3698 = vmatpush3.bf16.xpose.msra.mxu1 %v1610_v44  ;;  %3699 = vmatprep.mubr.msk.bf16.mxu1 %vm4091_vm0, %v4090_v18 }
 0x705   : > { %3709 = vmatprep.subr.bf16.mxu1 %v4090_v18 }
 0x70b   : > { %3700 = vmatmul.mubr.msk.bf16.vlgmr.msra.gmra.mxu1 %vm969_vm1, %v1603_v45 }
 0x70c   : > { %3711 = vmatprep.mubr.msk.bf16.mxu1 %vm4091_vm0, %v4090_v18 }
 0x7b4   : > { %v1469_v48 = vpop.f32.mrf.mxu0 }
 0x7b6   : > { %v3681_v49 = vpop.f32.mrf.mxu0 }
 0x7b8   : > { %v1472_v50 = vpop.f32.mrf.mxu0 }
 0x7b9   : > { %v1524_v51 = vpack.c.bf16 %v1472_v50, %v1469_v48 }
 0x7ba   : > { %v3682_v52 = vpop.f32.mrf.mxu0 }
 0x7bb   : > { %3693 = vmatprep.mubr.msk.bf16.mxu0 %vm969_vm1, %v1524_v51 }
 0x7c3   : > { %v1517_v53 = vpop.f32.mrf.mxu1 }
 0x7c5   : > { %v3687_v54 = vpop.f32.mrf.mxu1 }
 0x7c7   : > { %v1520_v56 = vpop.f32.mrf.mxu1 }
 0x7c8   : > { %v1525_v57 = vpack.c.bf16 %v1520_v56, %v1517_v53 }
 0x7c9   : > { %v3688_v58 = vpop.f32.mrf.mxu1 }
 0x7ca   : > { %3694 = vmatmul.mubr.msk.bf16.vlgmr.msra.gmra.mxu0 %vm969_vm1, %v1525_v57 }
 0x7cb   : > { %3704 = vmatpush3.bf16.xpose.msra.mxu0 %v1661_v59  ;;  %v1646_v60 = vpop.f32.mrf.mxu1  ;;  %3705 = vmatprep.mubr.msk.bf16.mxu0 %vm4091_vm0, %v4090_v18 }
 0x7cc   : > { %v1704_v1 = vsel %vm1064_vm2, %v1646_v60, -inf  ;;  %3715 = vmatprep.subr.bf16.mxu0 %v4090_v18 }
 0x7cd   : > { %1705 = vmax.xlane.f32.xlu0 %v1704_v1  ;;  %v3701_v2 = vpop.f32.mrf.mxu1 }
 0x7cf   : > { %v1649_v3 = vpop.f32.mrf.mxu1 }
 0x7d0   : > { %v1707_v4 = vsel %vm1064_vm2, %v1649_v3, -inf }
 0x7d1   : > { %1708 = vmax.xlane.f32.xlu1 %v1707_v4  ;;  %v3702_v6 = vpop.f32.mrf.mxu1 }
 0x7d2   : > { %3706 = vmatmul.mubr.msk.bf16.vlgmr.msra.gmra.mxu0 %vm969_vm1, %v1654_v5 }
 0x7d3   : > { %3717 = vmatprep.mubr.msk.bf16.mxu0 %vm4091_vm0, %v4090_v18 }
 0x856   : > { %v1706_v12 = vpop.xlane.xlu0 %1705 }
 0x857   : > { %v1716_v14 = vsub.f32 %v1646_v60, %v1706_v12 }
 0x859   : > { %v1720_v20 = vmul.f32 1.442695, %v1716_v14  ;;  %v3838_v14 = vld [vmem:[%s4201_s19 + $0x20] sm:$0xff]  }
 0x85a   : > { %v1709_v7 = vpop.xlane.xlu1 %1708 }
 0x85b   : > { %v1717_v8 = vsub.f32 %v1649_v3, %v1709_v7 }
 0x85d   : > { %v1722_v9 = vmul.f32 1.442695, %v1717_v8 }
 0x85f   : > { %3961 = vpow2.f32 %v1722_v9 }
 0x860   : > { %3963 = vpow2.f32 %v1720_v20 }
 0x86c   : > { %v4434_v10 = vpop.eup %3961 }
 0x86d   : > { %v1731_v11 = vsel %vm1064_vm2, %v4434_v10, 0.0  ;;  %v3964_v47 = vpop.eup %3963 }
 0x86e   : > { %1732 = vadd.xlane.f32.xlu1 %v1731_v11  ;;  %v1728_v48 = vsel %vm1064_vm2, %v3964_v47, 0.0 }
 0x88a   : > { %v3695_v25 = vpop.f32.mrf.mxu0 }
 0x88b   : > { %v4445_v29 = vadd.f32 %v3695_v25, %v1274_v21 }
 0x88c   : > { %v1583_v30 = vpop.f32.mrf.mxu0 }
 0x88d   : > { %v4448_v35 = vadd.f32 %v1583_v30, %v1272_v26 }
 0x88e   : > { %v3696_v38 = vpop.f32.mrf.mxu0 }
 0x88f   : > { %v4451_v40 = vadd.f32 %v3696_v38, %v1275_v31 }
 0x890   : > { %v1586_v61 = vpop.f32.mrf.mxu0 }
 0x891   : > { %v4453_v41 = vadd.f32 %v1586_v61, %v1273_v39 }
 0x892   : > { %v1697_v42 = vpop.f32.mrf.mxu0 }
 0x893   : > { %v1710_v62 = vsel %vm1064_vm2, %v1697_v42, -inf }
 0x894   : > { %1711 = vmax.xlane.f32.xlu0 %v1710_v62  ;;  %v3707_v44 = vpop.f32.mrf.mxu0 }
 0x896   : > { %v1700_v45 = vpop.f32.mrf.mxu0 }
 0x897   : > { %v1713_v46 = vsel %vm1064_vm2, %v1700_v45, -inf }
 0x898   : > { %1714 = vmax.xlane.f32.xlu0 %v1713_v46  ;;  %v3708_v63 = vpop.f32.mrf.mxu0 }
 0x89c   : > { %1729 = vadd.xlane.f32.xlu0 %v1728_v48 }
 0x8f7   : > { %v1733_v59 = vpop.xlane.xlu1 %1732 }
 0x91d   : > { %v1712_v0 = vpop.xlane.xlu0 %1711 }
 0x91e   : > { %v1718_v49 = vsub.f32 %v1697_v42, %v1712_v0 }
 0x920   : > { %v1724_v50 = vmul.f32 1.442695, %v1718_v49 }
 0x921   : > { %v1715_v51 = vpop.xlane.xlu0 %1714 }
 0x922   : > { %3965 = vpow2.f32 %v1724_v50  ;;  %v1719_v52 = vsub.f32 %v1700_v45, %v1715_v51 }
 0x924   : > { %v1726_v53 = vmul.f32 1.442695, %v1719_v52 }
 0x925   : > { %v1730_v58 = vpop.xlane.xlu0 %1729 }
 0x926   : > { %3967 = vpow2.f32 %v1726_v53 }
 0x927   : > { %3969 = vrcp.f32 %v1730_v58 }
 0x928   : > { %3971 = vrcp.f32 %v1733_v59 }
 0x92f   : > { %v3966_v54 = vpop.eup %3965 }
 0x930   : > { %v1734_v55 = vsel %vm1064_vm2, %v3966_v54, 0.0 }
 0x931   : > { %1735 = vadd.xlane.f32.xlu0 %v1734_v55 }
 0x933   : > { %v3968_v56 = vpop.eup %3967 }
 0x934   : > { %v1737_v57 = vsel %vm1064_vm2, %v3968_v56, 0.0  ;;  %v3970_v60 = vpop.eup %3969 }
 0x935   : > { %1738 = vadd.xlane.f32.xlu1 %v1737_v57  ;;  %v3972_v2 = vpop.eup %3971  ;;  %v1744_v3 = vmul.f32 %v3970_v60, %v3964_v47 }
 0x936   : > { %v1745_v5 = vmul.f32 %v3972_v2, %v4434_v10 }
 0x946   : > { %1797 = vrot.lane.b32.xlu1 %v4337_v37, %s4093_s28 }
 0x947   : > { %1750 = vrot.lane.b32.xlu0 %v4325_v34, %s4093_s28 }
 0x94a   : > { %1924 = vrot.lane.b32.xlu1 %v4316_v24, %s4094_s25 }
 0x94b   : > { %1922 = vrot.lane.b32.xlu0 %v4321_v32, %s4094_s25  ;;  %v1748_v32 = vpack.c.bf16 %v1745_v5, %v1744_v3 }
 0x94e   : > { %1975 = vrot.lane.b32.xlu1 %v4323_v33, %s4094_s25 }
 0x952   : > { %1973 = vrot.lane.b32.xlu1 %v4335_v36, %s4094_s25 }
 0x9ba   : > { %v1736_v1 = vpop.xlane.xlu0 %1735 }
 0x9bb   : > { %3973 = vrcp.f32 %v1736_v1 }
 0x9be   : > { %v1739_v4 = vpop.xlane.xlu1 %1738  ;;  %v1751_v24 = vpop.permute.xlu0 %1750 }
 0x9bf   : > { %3975 = vrcp.f32 %v1739_v4  ;;  %3710 = vmatpush3.bf16.msra.mxu1 %v1751_v24 }
 0x9c0   : > { %3721 = vmatprep.subr.bf16.mxu1 %v3837_v13 }
 0x9c2   : > { %v1798_v33 = vpop.permute.xlu1 %1797  ;;  %3712 = vmatmul.mubr.msk.bf16.vlgmr.msra.gmra.mxu1 %vm1064_vm2, %v1748_v32  ;;  %v1923_v10 = vpop.permute.xlu0 %1922 }
 0x9c3   : > { %3716 = vmatpush3.bf16.msra.mxu0 %v1798_v33  ;;  %3722 = vmatpush3.bf16.msra.mxu1 %v3837_v13 }
 0x9c4   : > { %3729 = vmatprep.subr.bf16.mxu0 %v4090_v18  ;;  %3723 = vmatprep.subr.bf16.mxu1 %v3838_v14 }
 0x9c6   : > { %v1925_v9 = vpop.permute.xlu1 %1924 }
 0x9c7   : > { %v1930_v12 = vsel %vm969_vm1, %v1925_v9, 0  ;;  %3724 = vmatpush3.bf16.msra.mxu1 %v3838_v14 }
 0x9c8   : > { %v3974_v36 = vpop.eup %3973  ;;  %3735 = vmatprep.subr.bf16.mxu1 %v4090_v18 }
 0x9c9   : > { %v1746_v7 = vmul.f32 %v3974_v36, %v3966_v54 }
 0x9ca   : > { %v1976_v23 = vpop.permute.xlu1 %1975 }
 0x9cb   : > { %v1981_v28 = vsel %vm969_vm1, %v1976_v23, 0  ;;  %v3840_v23 = vld [vmem:[%s4201_s19 + $0x30] sm:$0xff]  }
 0x9cc   : > { %v3976_v6 = vpop.eup %3975 }
 0x9cd   : > { %v1747_v8 = vmul.f32 %v3976_v6, %v3968_v56 }
 0x9ce   : > { %v1974_v42 = vpop.permute.xlu1 %1973 }
 0x9cf   : > { %v1749_v11 = vpack.c.bf16 %v1747_v8, %v1746_v7 }
 0x9d1   : > { %3718 = vmatmul.mubr.msk.bf16.vlgmr.msra.gmra.mxu0 %vm1064_vm2, %v1749_v11 }
 0x9d2   : > { %3730 = vmatpush3.bf16.xpose.msra.mxu0 %v1930_v12  ;;  %3731 = vmatprep.mubr.msk.bf16.mxu0 %vm4091_vm0, %v4090_v18 }
 0x9d3   : > { %3741 = vmatprep.subr.bf16.mxu0 %v4090_v18 }
 0x9d9   : > { %3732 = vmatmul.mubr.msk.bf16.vlgmr.msra.gmra.mxu0 %vm969_vm1, %v1923_v10 }
 0x9da   : > { %3743 = vmatprep.mubr.msk.bf16.mxu0 %vm4091_vm0, %v4090_v18 }
 0xa82   : > { %v1790_v16 = vpop.f32.mrf.mxu1 }
 0xa84   : > { %v3713_v17 = vpop.f32.mrf.mxu1 }
 0xa86   : > { %v1793_v15 = vpop.f32.mrf.mxu1 }
 0xa87   : > { %v1844_v19 = vpack.c.bf16 %v1793_v15, %v1790_v16 }
 0xa88   : > { %v3714_v20 = vpop.f32.mrf.mxu1 }
 0xa89   : > { %3725 = vmatprep.mubr.msk.bf16.mxu1 %vm969_vm1, %v1844_v19 }
 0xa91   : > { %v1837_v21 = vpop.f32.mrf.mxu0 }
 0xa93   : > { %v3719_v22 = vpop.f32.mrf.mxu0 }
 0xa94   : > { %v3839_v22 = vld [vmem:[%s4201_s19 + $0x38] sm:$0xff]  }
 0xa95   : > { %v1840_v25 = vpop.f32.mrf.mxu0 }
 0xa96   : > { %v1845_v26 = vpack.c.bf16 %v1840_v25, %v1837_v21 }
 0xa97   : > { %v3720_v27 = vpop.f32.mrf.mxu0 }
 0xa98   : > { %3726 = vmatmul.mubr.msk.bf16.vlgmr.msra.gmra.mxu1 %vm969_vm1, %v1845_v26 }
 0xa99   : > { %3736 = vmatpush3.bf16.xpose.msra.mxu1 %v1981_v28  ;;  %v1966_v30 = vpop.f32.mrf.mxu0  ;;  %3737 = vmatprep.mubr.msk.bf16.mxu1 %vm4091_vm0, %v4090_v18 }
 0xa9a   : > { %v2024_v31 = vsel %vm1064_vm2, %v1966_v30, -inf  ;;  %3747 = vmatprep.subr.bf16.mxu1 %v4090_v18 }
 0xa9b   : > { %2025 = vmax.xlane.f32.xlu0 %v2024_v31  ;;  %v3733_v38 = vpop.f32.mrf.mxu0 }
 0xa9d   : > { %v1969_v39 = vpop.f32.mrf.mxu0 }
 0xa9e   : > { %v2027_v61 = vsel %vm1064_vm2, %v1969_v39, -inf }
 0xa9f   : > { %2028 = vmax.xlane.f32.xlu1 %v2027_v61  ;;  %v3734_v62 = vpop.f32.mrf.mxu0 }
 0xaa0   : > { %3738 = vmatmul.mubr.msk.bf16.vlgmr.msra.gmra.mxu1 %vm969_vm1, %v1974_v42 }
 0xaa1   : > { %3749 = vmatprep.mubr.msk.bf16.mxu1 %vm4091_vm0, %v4090_v18 }
 0xb24   : > { %v2026_v48 = vpop.xlane.xlu0 %2025 }
 0xb25   : > { %v2036_v0 = vsub.f32 %v1966_v30, %v2026_v48 }
 0xb27   : > { %v2040_v49 = vmul.f32 1.442695, %v2036_v0 }
 0xb28   : > { %v2029_v44 = vpop.xlane.xlu1 %2028 }
 0xb29   : > { %v2037_v45 = vsub.f32 %v1969_v39, %v2029_v44 }
 0xb2b   : > { %v2042_v46 = vmul.f32 1.442695, %v2037_v45 }
 0xb2d   : > { %3977 = vpow2.f32 %v2042_v46 }
 0xb2e   : > { %3979 = vpow2.f32 %v2040_v49  ;;  %v3841_v49 = vld [vmem:[%s4224_s4 + $0xe0] ss:$16 sps:$4 sm:$0xff]  }
 0xb3a   : > { %v3978_v47 = vpop.eup %3977 }
 0xb3b   : > { %v2051_v63 = vsel %vm1064_vm2, %v3978_v47, 0.0  ;;  %v3980_v1 = vpop.eup %3979 }
 0xb3c   : > { %2052 = vadd.xlane.f32.xlu1 %v2051_v63 }
 0xb58   : > { %v3727_v50 = vpop.f32.mrf.mxu1 }
 0xb59   : > { %v4499_v51 = vadd.f32 %v3727_v50, %v4445_v29  ;;  %v3843_v50 = vld [vmem:[%s4224_s4 + $0xe4] ss:$16 sps:$4 sm:$0xff]  }
 0xb5a   : > { %v1903_v52 = vpop.f32.mrf.mxu1 }
 0xb5b   : > { %v4502_v53 = vadd.f32 %v1903_v52, %v4448_v35  ;;  %v2048_v35 = vsel %vm1064_vm2, %v3980_v1, 0.0  ;;  %v3844_v52 = vld [vmem:[%s4224_s4 + $0xe8] ss:$16 sps:$4 sm:$0xff]  }
 0xb5c   : > { %v3728_v18 = vpop.f32.mrf.mxu1 }
 0xb5d   : > { %v4505_v54 = vadd.f32 %v3728_v18, %v4451_v40 }
 0xb5e   : > { %v1906_v55 = vpop.f32.mrf.mxu1 }
 0xb5f   : > { %v4508_v56 = vadd.f32 %v1906_v55, %v4453_v41 }
 0xb60   : > { %v2017_v57 = vpop.f32.mrf.mxu1 }
 0xb61   : > { %v2030_v58 = vsel %vm1064_vm2, %v2017_v57, -inf }
 0xb62   : > { %v3739_v59 = vpop.f32.mrf.mxu1  ;;  %2031 = vmax.xlane.f32.xlu0 %v2030_v58 }
 0xb64   : > { %v2020_v60 = vpop.f32.mrf.mxu1 }
 0xb65   : > { %v2033_v29 = vsel %vm1064_vm2, %v2020_v60, -inf }
 0xb66   : > { %v3740_v2 = vpop.f32.mrf.mxu1  ;;  %2034 = vmax.xlane.f32.xlu0 %v2033_v29 }
 0xb6a   : > { %2049 = vadd.xlane.f32.xlu0 %v2048_v35 }
 0xbc5   : > { %v2053_v8 = vpop.xlane.xlu1 %2052 }
 0xbeb   : > { %v2032_v40 = vpop.xlane.xlu0 %2031 }
 0xbec   : > { %v2038_v3 = vsub.f32 %v2017_v57, %v2032_v40 }
 0xbee   : > { %v2044_v4 = vmul.f32 1.442695, %v2038_v3 }
 0xbef   : > { %v2035_v24 = vpop.xlane.xlu0 %2034 }
 0xbf0   : > { %3981 = vpow2.f32 %v2044_v4  ;;  %v2039_v41 = vsub.f32 %v2020_v60, %v2035_v24  ;;  %v3849_v24 = vld [vmem:[%s4224_s4 + $0xc4] ss:$16 sps:$4 sm:$0xff]  }
 0xbf2   : > { %v2046_v5 = vmul.f32 1.442695, %v2039_v41  ;;  %v3852_v41 = vld [vmem:[%s4224_s4 + $0xcc] ss:$16 sps:$4 sm:$0xff]  }
 0xbf3   : > { %v2050_v7 = vpop.xlane.xlu0 %2049 }
 0xbf4   : > { %3983 = vpow2.f32 %v2046_v5  ;;  %v3847_v5 = vld [vmem:[%s4224_s4 + $0xc0] ss:$16 sps:$4 sm:$0xff]  }
 0xbf5   : > { %3985 = vrcp.f32 %v2050_v7  ;;  %v3856_v7 = vld [vmem:[%s4224_s4 + $0xa8] ss:$16 sps:$4 sm:$0xff]  }
 0xbf6   : > { %3987 = vrcp.f32 %v2053_v8  ;;  %v3861_v8 = vld [vmem:[%s4224_s4 + $0x84] ss:$16 sps:$4 sm:$0xff]  }
 0xbfd   : > { %v3982_v32 = vpop.eup %3981 }
 0xbfe   : > { %v2054_v33 = vsel %vm1064_vm2, %v3982_v32, 0.0 }
 0xbff   : > { %2055 = vadd.xlane.f32.xlu0 %v2054_v33  ;;  %v3855_v33 = vld [vmem:[%s4224_s4 + $0xa4] ss:$16 sps:$4 sm:$0xff]  }
 0xc01   : > { %v3984_v36 = vpop.eup %3983 }
 0xc02   : > { %v2057_v6 = vsel %vm1064_vm2, %v3984_v36, 0.0  ;;  %v3986_v9 = vpop.eup %3985 }
 0xc03   : > { %2058 = vadd.xlane.f32.xlu1 %v2057_v6  ;;  %v3988_v12 = vpop.eup %3987  ;;  %v2064_v10 = vmul.f32 %v3986_v9, %v3980_v1  ;;  %v3853_v6 = vld [vmem:[%s4224_s4 + $0xa0] ss:$16 sps:$4 sm:$0xff]   ;;  %v3864_v9 = vld [vmem:[%s4224_s4 + $0x8c] ss:$16 sps:$4 sm:$0xff]  }
 0xc04   : > { %v2065_v16 = vmul.f32 %v3988_v12, %v3978_v47  ;;  %v3862_v12 = vld [vmem:[%s4224_s4 + $0x88] ss:$16 sps:$4 sm:$0xff]  }
 0xc14   : > { %2117 = vrot.lane.b32.xlu1 %v4337_v37, %s4094_s25  ;;  %v2068_v37 = vpack.c.bf16 %v2065_v16, %v2064_v10  ;;  %v3865_v10 = vld [vmem:[%s4224_s4 + $0x60] ss:$16 sps:$4 sm:$0xff]   ;;  %v3870_v16 = vld [vmem:[%s4224_s4 + $0x6c] ss:$16 sps:$4 sm:$0xff]  }
 0xc15   : > { %2070 = vrot.lane.b32.xlu0 %v4325_v34, %s4094_s25 }
 0xc88   : > { %v2056_v11 = vpop.xlane.xlu0 %2055 }
 0xc89   : > { %3989 = vrcp.f32 %v2056_v11  ;;  %v3859_v11 = vld [vmem:[%s4224_s4 + $0x80] ss:$16 sps:$4 sm:$0xff]  }
 0xc8c   : > { %v2071_v13 = vpop.permute.xlu0 %2070  ;;  %v2059_v14 = vpop.xlane.xlu1 %2058 }
 0xc8d   : > { %3991 = vrcp.f32 %v2059_v14  ;;  %3742 = vmatpush3.bf16.msra.mxu0 %v2071_v13  ;;  %v3867_v13 = vld [vmem:[%s4224_s4 + $0x64] ss:$16 sps:$4 sm:$0xff]   ;;  %v3868_v14 = vld [vmem:[%s4224_s4 + $0x68] ss:$16 sps:$4 sm:$0xff]  }
 0xc8e   : > { %3753 = vmatprep.subr.bf16.mxu0 %v3839_v22 }
 0xc90   : > { %3744 = vmatmul.mubr.msk.bf16.vlgmr.msra.gmra.mxu0 %vm1064_vm2, %v2068_v37  ;;  %v2118_v34 = vpop.permute.xlu1 %2117  ;;  %v3873_v37 = vld [vmem:[%s4224_s4 + $0x44] ss:$16 sps:$4 sm:$0xff]  }
 0xc91   : > { %3748 = vmatpush3.bf16.msra.mxu1 %v2118_v34  ;;  %3754 = vmatpush3.bf16.msra.mxu0 %v3839_v22  ;;  %v3876_v34 = vld [vmem:[%s4224_s4 + $0x4c] ss:$16 sps:$4 sm:$0xff]   ;;  %v3880_v22 = vld [vmem:[%s4224_s4 + $0x28] ss:$16 sps:$4 sm:$0xff]  }
 0xc92   : > { %3755 = vmatprep.subr.bf16.mxu0 %v3840_v23  ;;  %2524 = vmatprep.subr.bf16.mxu1 %v3843_v50 }
 0xc95   : > { %3756 = vmatpush3.bf16.msra.mxu0 %v3840_v23  ;;  %v3885_v23 = vld [vmem:[%s4224_s4 + $0x4] ss:$16 sps:$4 sm:$0xff]  }
 0xc96   : > { %v3990_v17 = vpop.eup %3989 }
 0xc97   : > { %v2066_v19 = vmul.f32 %v3990_v17, %v3982_v32  ;;  %v3850_v32 = vld [vmem:[%s4224_s4 + $0xc8] ss:$16 sps:$4 sm:$0xff]   ;;  %v3871_v17 = vld [vmem:[%s4224_s4 + $0x40] ss:$16 sps:$4 sm:$0xff]  }
 0xc9a   : > { %v3992_v15 = vpop.eup %3991 }
 0xc9b   : > { %v2067_v20 = vmul.f32 %v3992_v15, %v3984_v36  ;;  %v3858_v36 = vld [vmem:[%s4224_s4 + $0xac] ss:$16 sps:$4 sm:$0xff]   ;;  %v3874_v15 = vld [vmem:[%s4224_s4 + $0x48] ss:$16 sps:$4 sm:$0xff]  }
 0xc9d   : > { %v2069_v21 = vpack.c.bf16 %v2067_v20, %v2066_v19  ;;  %v3879_v19 = vld [vmem:[%s4224_s4 + $0x24] ss:$16 sps:$4 sm:$0xff]   ;;  %v3882_v20 = vld [vmem:[%s4224_s4 + $0x2c] ss:$16 sps:$4 sm:$0xff]  }
 0xc9f   : > { %3750 = vmatmul.mubr.msk.bf16.vlgmr.msra.gmra.mxu1 %vm1064_vm2, %v2069_v21  ;;  %v3877_v21 = vld [vmem:[%s4224_s4 + $0x20] ss:$16 sps:$4 sm:$0xff]  }
 0xca0   : > { %2556 = vmatprep.mubr.bf16.mxu1 %v4089_v43  ;;  %2525 = vmatpush1.bf16.msra.mxu1 %v3841_v49 }
 0xca1   : > { %2526 = vmatprep.subr.bf16.mxu1 %v3849_v24 }
 0xca4   : > { %2527 = vmatpush1.bf16.msra.mxu1 %v3847_v5  ;;  %v3890_v5 = vld [vmem:[%s4235_s12 + $0xf8] sm:$0xff]  }
 0xca5   : > { %2528 = vmatprep.subr.bf16.mxu1 %v3855_v33  ;;  %v3892_v33 = vld [vmem:[%s4235_s12 + $0xb8] sm:$0xff]  }
 0xca8   : > { %2529 = vmatpush1.bf16.msra.mxu1 %v3853_v6  ;;  %v3895_v6 = vld [vmem:[%s4235_s12 + $0x30] sm:$0xff]  }
 0xca9   : > { %2530 = vmatprep.subr.bf16.mxu1 %v3861_v8  ;;  %v3897_v8 = vld [vmem:[%s4235_s12 + $0x68] sm:$0xff]  }
 0xcac   : > { %2531 = vmatpush1.bf16.msra.mxu1 %v3859_v11  ;;  %v3899_v11 = vld [vmem:[%s4235_s12 + $0x28] sm:$0xff]  }
 0xcad   : > { %2532 = vmatprep.subr.bf16.mxu1 %v3867_v13  ;;  %v3902_v13 = vld [vmem:[%s4235_s12 + $0xe0] sm:$0xff]  }
 0xcb0   : > { %2533 = vmatpush1.bf16.msra.mxu1 %v3865_v10  ;;  %v3901_v10 = vld [vmem:[%s4235_s12 + $0x60] sm:$0xff]  }
 0xcb1   : > { %2534 = vmatprep.subr.bf16.mxu1 %v3873_v37  ;;  %v3905_v37 = vld [vmem:[%s4235_s12 + $0x58] sm:$0xff]  }
 0xcb4   : > { %2535 = vmatpush1.bf16.msra.mxu1 %v3871_v17  ;;  %v3907_v17 = vld [vmem:[%s4235_s12 + $0x18] sm:$0xff]  }
 0xcb5   : > { %2536 = vmatprep.subr.bf16.mxu1 %v3879_v19  ;;  %v3909_v19 = vld [vmem:[%s4235_s12 + $0x50] sm:$0xff]  }
 0xcb8   : > { %2537 = vmatpush1.bf16.msra.mxu1 %v3877_v21  ;;  %v3911_v21 = vld [vmem:[%s4235_s12 + $0x10] sm:$0xff]  }
 0xcb9   : > { %2538 = vmatprep.subr.bf16.mxu1 %v3885_v23  ;;  %v3913_v23 = vld [vmem:[%s4235_s12 + $0x48] sm:$0xff]  }
 0xd50   : > { %v2110_v25 = vpop.f32.mrf.mxu0 }
 0xd52   : > { %v3745_v26 = vpop.f32.mrf.mxu0 }
 0xd53   : > { %v3883_v26 = vld [vmem:[%s4224_s4] ss:$16 sps:$4 sm:$0xff]  }
 0xd54   : > { %v2113_v27 = vpop.f32.mrf.mxu0  ;;  %2539 = vmatpush1.bf16.msra.mxu1 %v3883_v26  ;;  %v3915_v26 = vld [vmem:[%s4235_s12 + $0x8] sm:$0xff]  }
 0xd55   : > { %v2164_v28 = vpack.c.bf16 %v2113_v27, %v2110_v25  ;;  %v3888_v25 = vld [vmem:[%s4224_s4 + $0xc] ss:$16 sps:$4 sm:$0xff]   ;;  %v3886_v27 = vld [vmem:[%s4224_s4 + $0x8] ss:$16 sps:$4 sm:$0xff]  }
 0xd56   : > { %v3746_v30 = vpop.f32.mrf.mxu0 }
 0xd57   : > { %3757 = vmatprep.mubr.msk.bf16.mxu0 %vm969_vm1, %v2164_v28 }
 0xd5f   : > { %v2157_v31 = vpop.f32.mrf.mxu1 }
 0xd61   : > { %v3751_v38 = vpop.f32.mrf.mxu1 }
 0xd63   : > { %v2160_v39 = vpop.f32.mrf.mxu1 }
 0xd64   : > { %v2165_v61 = vpack.c.bf16 %v2160_v39, %v2157_v31 }
 0xd65   : > { %v3752_v42 = vpop.f32.mrf.mxu1 }
 0xd66   : > { %3758 = vmatmul.mubr.msk.bf16.vlgmr.msra.gmra.mxu0 %vm969_vm1, %v2165_v61 }
 0xd67   : > { %2609 = vmatprep.mubr.bf16.mxu0 %v4089_v43 }
 0xe26   : > { %v3759_v62 = vpop.f32.mrf.mxu0 }
 0xe27   : > { %v4540_v0 = vadd.f32 %v3759_v62, %v4499_v51 }
 0xe28   : > { %v2223_v44 = vpop.f32.mrf.mxu0 }
 0xe29   : > { %v4528_v45 = vadd.f32 %v2223_v44, %v4502_v53  ;;  %v3846_v53 = vld [vmem:[%s4224_s4 + $0xec] ss:$16 sps:$4 sm:$0xff]  }
 0xe2a   : > { %v3760_v46 = vpop.f32.mrf.mxu0  ;;  %2577 = vmatprep.subr.bf16.mxu0 %v3846_v53  ;;  %v3424_v53 = vld [vmem:[%s582_s30] ss:$0 sm:$0xff] }
 0xe2b   : > { %2244 = vadd.xlane.f32.xlu1 %v4528_v45  ;;  %v4532_v63 = vadd.f32 %v3760_v46, %v4505_v54  ;;  %2578 = vmatpush1.bf16.msra.mxu0 %v3844_v52 }
 0xe2c   : > { %v2226_v47 = vpop.f32.mrf.mxu0  ;;  %2579 = vmatprep.subr.bf16.mxu0 %v3852_v41 }
 0xe2d   : > { %v4535_v48 = vadd.f32 %v2226_v47, %v4508_v56 }
 0xe2f   : > { %2246 = vadd.xlane.f32.xlu0 %v4535_v48  ;;  %2250 = vadd.xlane.f32.xlu1 %v4532_v63 }
 0xe30   : > { %2580 = vmatpush1.bf16.msra.mxu0 %v3850_v32  ;;  %v3891_v32 = vld [vmem:[%s4235_s12 + $0x38] sm:$0xff]  }
 0xe31   : > { %2581 = vmatprep.subr.bf16.mxu0 %v3858_v36  ;;  %v3894_v36 = vld [vmem:[%s4235_s12 + $0xf0] sm:$0xff]  }
 0xe33   : > { %2248 = vadd.xlane.f32.xlu0 %v4540_v0 }
 0xe34   : > { %2582 = vmatpush1.bf16.msra.mxu0 %v3856_v7  ;;  %v3896_v7 = vld [vmem:[%s4235_s12 + $0xb0] sm:$0xff]  }
 0xe35   : > { %2583 = vmatprep.subr.bf16.mxu0 %v3864_v9  ;;  %v3898_v9 = vld [vmem:[%s4235_s12 + $0xe8] sm:$0xff]  }
 0xe38   : > { %2584 = vmatpush1.bf16.msra.mxu0 %v3862_v12  ;;  %v3900_v12 = vld [vmem:[%s4235_s12 + $0xa8] sm:$0xff]  }
 0xe39   : > { %2585 = vmatprep.subr.bf16.mxu0 %v3870_v16  ;;  %v3904_v16 = vld [vmem:[%s4235_s12 + $0xa0] sm:$0xff]  }
 0xe3c   : > { %2586 = vmatpush1.bf16.msra.mxu0 %v3868_v14  ;;  %v3903_v14 = vld [vmem:[%s4235_s12 + $0x20] sm:$0xff]  }
 0xe3d   : > { %2587 = vmatprep.subr.bf16.mxu0 %v3876_v34  ;;  %v3906_v34 = vld [vmem:[%s4235_s12 + $0xd8] sm:$0xff]  }
 0xe40   : > { %2588 = vmatpush1.bf16.msra.mxu0 %v3874_v15  ;;  %v3908_v15 = vld [vmem:[%s4235_s12 + $0x98] sm:$0xff]  }
 0xe41   : > { %2589 = vmatprep.subr.bf16.mxu0 %v3882_v20  ;;  %v3910_v20 = vld [vmem:[%s4235_s12 + $0xd0] sm:$0xff]  }
 0xe44   : > { %2590 = vmatpush1.bf16.msra.mxu0 %v3880_v22  ;;  %v3912_v22 = vld [vmem:[%s4235_s12 + $0x90] sm:$0xff]  }
 0xe45   : > { %2591 = vmatprep.subr.bf16.mxu0 %v3888_v25  ;;  %v3914_v25 = vld [vmem:[%s4235_s12 + $0xc8] sm:$0xff]  }
 0xe48   : > { %2592 = vmatpush1.bf16.msra.mxu0 %v3886_v27  ;;  %v3916_v27 = vld [vmem:[%s4235_s12 + $0x88] sm:$0xff]  }
 0xe49   : > { %3585 = vmatprep.subr.bf16.mxu0 %v3890_v5 }
 0xeb4   : > { %v2245_v18 = vpop.xlane.xlu1 %2244 }
 0xeb5   : > { %v2252_v54 = vmul.f32 0.0078125, %v2245_v18 }
 0xeb7   : > { %v4548_v55 = vsub.f32 %v4528_v45, %v2252_v54 }
 0xeb8   : > { %v2247_v56 = vpop.xlane.xlu0 %2246  ;;  %v2251_v57 = vpop.xlane.xlu1 %2250 }
 0xeb9   : > { %v2253_v51 = vmul.f32 0.0078125, %v2247_v56  ;;  %v2255_v58 = vmul.f32 0.0078125, %v2251_v57  ;;  %v2260_v59 = vmul.f32 %v4548_v55, %v4548_v55  ;;  %v3425_v57 = vld [vmem:[%s4840_s15] ss:$0 sm:$0xff] }
 0xebb   : > { %v4553_v60 = vsub.f32 %v4535_v48, %v2253_v51  ;;  %2264 = vadd.xlane.f32.xlu0 %v2260_v59  ;;  %v4556_v1 = vsub.f32 %v4532_v63, %v2255_v58 }
 0xebc   : > { %v2249_v29 = vpop.xlane.xlu0 %2248 }
 0xebd   : > { %v2254_v2 = vmul.f32 0.0078125, %v2249_v29  ;;  %v2261_v35 = vmul.f32 %v4553_v60, %v4553_v60  ;;  %v2263_v4 = vmul.f32 %v4556_v1, %v4556_v1 }
 0xebf   : > { %v4561_v40 = vsub.f32 %v4540_v0, %v2254_v2  ;;  %2266 = vadd.xlane.f32.xlu1 %v2261_v35 }
 0xec1   : > { %v2262_v3 = vmul.f32 %v4561_v40, %v4561_v40 }
 0xec3   : > { %2268 = vadd.xlane.f32.xlu0 %v2262_v3  ;;  %2270 = vadd.xlane.f32.xlu1 %v2263_v4 }
 0xf44   : > { %v2265_v28 = vpop.xlane.xlu0 %2264 }
 0xf45   : > { %v2272_v30 = vmul.f32 0.0078125, %v2265_v28  ;;  %v3917_v28 = vld [vmem:[%s4235_s12 + $0x40] sm:$0xff]  }
 0xf47   : > { %v2276_v31 = vadd.f32 1e-05, %v2272_v30  ;;  %v3918_v30 = vld [vmem:[%s4235_s12 + $0xc0] sm:$0xff]  }
 0xf48   : > { %v2267_v38 = vpop.xlane.xlu1 %2266 }
 0xf49   : > { %3993 = vrsqrt.f32 %v2276_v31  ;;  %v2273_v39 = vmul.f32 0.0078125, %v2267_v38  ;;  %v3919_v31 = vld [vmem:[%s4235_s12] sm:$0xff]  }
 0xf4a   : > { %v3920_v38 = vld [vmem:[%s4235_s12 + $0x80] sm:$0xff]  }
 0xf4b   : > { %v2277_v61 = vadd.f32 1e-05, %v2273_v39  ;;  %v2344_v39 = vlaneseq }
 0xf4c   : > { %v2269_v42 = vpop.xlane.xlu0 %2268  ;;  %v2271_v62 = vpop.xlane.xlu1 %2270 }
 0xf4d   : > { %3995 = vrsqrt.f32 %v2277_v61  ;;  %v2274_v44 = vmul.f32 0.0078125, %v2269_v42  ;;  %v2275_v46 = vmul.f32 0.0078125, %v2271_v62  ;;  %v2345_v61 = vshrl.u32 %v2344_v39, 7 }
 0xf4f   : > { %v2278_v47 = vadd.f32 1e-05, %v2274_v44  ;;  %v2279_v49 = vadd.f32 1e-05, %v2275_v46  ;;  %v2346_v42 = vsub.s32 0, %v2345_v61  ;;  %v2354_v62 = vsub.s32 2, %v2345_v61 }
 0xf50   : > { %v2342_v44 = vld [vmem:[%s4230_s24] sm:$0xf]  ;;  %v2350_v46 = vsub.s32 1, %v2345_v61 }
 0xf51   : > { %3997 = vrsqrt.f32 %v2278_v47  ;;  %v2358_v47 = vsub.s32 3, %v2345_v61 }
 0xf52   : > { %3999 = vrsqrt.f32 %v2279_v49  ;;  %v4644_v49 = vrot.slane %v2342_v44, %v2346_v42 }
 0xf56   : > { %v3994_v50 = vpop.eup %3993 }
 0xf57   : > { %v2284_v52 = vmul.f32 %v3994_v50, %v4548_v55  ;;  %v4646_v50 = vrot.slane %v2342_v44, %v2354_v62 }
 0xf59   : > { %v2294_v56 = vmul.f32 %v3424_v53, %v2284_v52  ;;  %v4648_v52 = vrot.slane %v2342_v44, %v2350_v46 }
 0xf5a   : > { %v3996_v18 = vpop.eup %3995 }
 0xf5b   : > { %v2285_v54 = vmul.f32 %v3996_v18, %v4553_v60  ;;  %v2304_v29 = vadd.f32 %v3425_v57, %v2294_v56 }
 0xf5d   : > { %v2295_v51 = vmul.f32 %v3424_v53, %v2285_v54 }
 0xf5e   : > { %v3998_v58 = vpop.eup %3997 }
 0xf5f   : > { %v4000_v59 = vpop.eup %3999  ;;  %v2305_v55 = vadd.f32 %v3425_v57, %v2295_v51  ;;  %v2286_v2 = vmul.f32 %v3998_v58, %v4561_v40 }
 0xf60   : > { %v2287_v35 = vmul.f32 %v4000_v59, %v4556_v1  ;;  %v3889_v1 = vld [vmem:[%s4235_s12 + $0x78] sm:$0xff]  }
 0xf61   : > { %v2308_v60 = vpack.c.bf16 %v2305_v55, %v2304_v29  ;;  %v2296_v3 = vmul.f32 %v3424_v53, %v2286_v2  ;;  %3557 = vmatprep.subr.bf16.mxu1 %v3889_v1 }
 0xf62   : > { %v2297_v4 = vmul.f32 %v3424_v53, %v2287_v35  ;;  %v4650_v53 = vrot.slane %v2342_v44, %v2358_v47 }
 0xf63   : > { %2557 = vmatmul.mubr.bf16.vlgmr.msra.gmra.mxu1 %v2308_v60  ;;  %2610 = vmatmul.mubr.bf16.vlgmr.msra.gmra.mxu0 %v2308_v60  ;;  %v2306_v24 = vadd.f32 %v3425_v57, %v2296_v3 }
 0xf64   : > { %2566 = vmatprep.mubr.bf16.mxu1 %v4089_v43  ;;  %2619 = vmatprep.mubr.bf16.mxu0 %v4089_v43  ;;  %v2307_v41 = vadd.f32 %v3425_v57, %v2297_v4  ;;  %v3893_v43 = vld [vmem:[%s4235_s12 + $0x70] sm:$0xff]  }
 0xf65   : > { %3558 = vmatpush3.bf16.msra.mxu1 %v3891_v32  ;;  %3586 = vmatpush3.bf16.msra.mxu0 %v3892_v33 }
 0xf66   : > { %v2309_v40 = vpack.c.bf16 %v2307_v41, %v2306_v24  ;;  %3559 = vmatprep.subr.bf16.mxu1 %v3893_v43  ;;  %3587 = vmatprep.subr.bf16.mxu0 %v3894_v36 }
 0xf69   : > { %3560 = vmatpush3.bf16.msra.mxu1 %v3895_v6  ;;  %3588 = vmatpush3.bf16.msra.mxu0 %v3896_v7 }
 0xf6a   : > { %3561 = vmatprep.subr.bf16.mxu1 %v3897_v8  ;;  %3589 = vmatprep.subr.bf16.mxu0 %v3898_v9 }
 0xf6b   : > { %2567 = vmatmul.mubr.bf16.gmra.mxu1 %v2309_v40  ;;  %2620 = vmatmul.mubr.bf16.gmra.mxu0 %v2309_v40 }
 0xf6d   : > { %3562 = vmatpush3.bf16.msra.mxu1 %v3899_v11  ;;  %3590 = vmatpush3.bf16.msra.mxu0 %v3900_v12 }
 0xf6e   : > { %3563 = vmatprep.subr.bf16.mxu1 %v3901_v10  ;;  %3591 = vmatprep.subr.bf16.mxu0 %v3902_v13 }
 0xf71   : > { %3564 = vmatpush3.bf16.msra.mxu1 %v3903_v14  ;;  %3592 = vmatpush3.bf16.msra.mxu0 %v3904_v16 }
 0xf72   : > { %3565 = vmatprep.subr.bf16.mxu1 %v3905_v37  ;;  %3593 = vmatprep.subr.bf16.mxu0 %v3906_v34 }
 0xf75   : > { %3566 = vmatpush3.bf16.msra.mxu1 %v3907_v17  ;;  %3594 = vmatpush3.bf16.msra.mxu0 %v3908_v15 }
 0xf76   : > { %3567 = vmatprep.subr.bf16.mxu1 %v3909_v19  ;;  %3595 = vmatprep.subr.bf16.mxu0 %v3910_v20 }
 0xf79   : > { %3568 = vmatpush3.bf16.msra.mxu1 %v3911_v21  ;;  %3596 = vmatpush3.bf16.msra.mxu0 %v3912_v22 }
 0xf7a   : > { %3569 = vmatprep.subr.bf16.mxu1 %v3913_v23  ;;  %3597 = vmatprep.subr.bf16.mxu0 %v3914_v25 }
 0xf7d   : > { %3570 = vmatpush3.bf16.msra.mxu1 %v3915_v26  ;;  %3598 = vmatpush3.bf16.msra.mxu0 %v3916_v27 }
 0xf7e   : > { %3571 = vmatprep.subr.bf16.mxu1 %v3917_v28  ;;  %3599 = vmatprep.subr.bf16.mxu0 %v3918_v30 }
 0xf81   : > { %3572 = vmatpush3.bf16.msra.mxu1 %v3919_v31  ;;  %3600 = vmatpush3.bf16.msra.mxu0 %v3920_v38 }
0x1023   : > { %v2558_v18 = vpop.f32.mrf.mxu1  ;;  %v2611_v54 = vpop.f32.mrf.mxu0 }
0x1024   : > { %v4653_v56 = vadd.f32 %v2558_v18, %v4644_v49  ;;  %v4656_v57 = vadd.f32 %v2611_v54, %v4646_v50 }
0x1025   : > { %v2560_v51 = vpop.f32.mrf.mxu1  ;;  %v2613_v58 = vpop.f32.mrf.mxu0 }
0x1026   : > { %v2630_v59 = vmul.f32 %v4653_v56, %v4653_v56  ;;  %v2632_v29 = vmul.f32 %v4656_v57, %v4656_v57  ;;  %v4663_v55 = vadd.f32 %v2560_v51, %v4648_v52  ;;  %v4666_v2 = vadd.f32 %v2613_v58, %v4650_v53 }
0x1027   : > { %v2562_v35 = vpop.f32.mrf.mxu1  ;;  %v2615_v60 = vpop.f32.mrf.mxu0 }
0x1028   : > { %v2646_v3 = vmul.f32 %v2630_v59, %v4653_v56  ;;  %v2648_v4 = vmul.f32 %v2632_v29, %v4656_v57  ;;  %v2631_v24 = vmul.f32 %v4663_v55, %v4663_v55  ;;  %v2633_v41 = vmul.f32 %v4666_v2, %v4666_v2 }
0x1029   : > { %v4675_v40 = vadd.f32 %v2562_v35, %v4644_v49  ;;  %v4678_v1 = vadd.f32 %v2615_v60, %v4646_v50  ;;  %v2564_v5 = vpop.f32.mrf.mxu1  ;;  %v2617_v32 = vpop.f32.mrf.mxu0 }
0x102a   : > { %v2662_v33 = vmul.f32 0.044715, %v2646_v3  ;;  %v2664_v43 = vmul.f32 0.044715, %v2648_v4  ;;  %v2647_v36 = vmul.f32 %v2631_v24, %v4663_v55  ;;  %v2649_v6 = vmul.f32 %v2633_v41, %v4666_v2 }
0x102b   : > { %v2634_v7 = vmul.f32 %v4675_v40, %v4675_v40  ;;  %v2636_v8 = vmul.f32 %v4678_v1, %v4678_v1  ;;  %v4687_v9 = vadd.f32 %v2564_v5, %v4648_v52  ;;  %v4690_v11 = vadd.f32 %v2617_v32, %v4650_v53  ;;  %v2568_v12 = vpop.f32.mrf.mxu1  ;;  %v2621_v10 = vpop.f32.mrf.mxu0 }
0x102c   : > { %v2678_v13 = vadd.f32 %v2662_v33, %v4653_v56  ;;  %v2680_v14 = vadd.f32 %v2664_v43, %v4656_v57  ;;  %v2663_v16 = vmul.f32 0.044715, %v2647_v36  ;;  %v2665_v37 = vmul.f32 0.044715, %v2649_v6 }
0x102d   : > { %v2650_v34 = vmul.f32 %v2634_v7, %v4675_v40  ;;  %v2652_v17 = vmul.f32 %v2636_v8, %v4678_v1  ;;  %v2635_v15 = vmul.f32 %v4687_v9, %v4687_v9  ;;  %v2637_v19 = vmul.f32 %v4690_v11, %v4690_v11  ;;  %v2570_v25 = vpop.f32.mrf.mxu1  ;;  %v2623_v31 = vpop.f32.mrf.mxu0 }
0x102e   : > { %v2694_v20 = vmul.f32 0.7978846, %v2678_v13  ;;  %v2696_v21 = vmul.f32 0.7978846, %v2680_v14  ;;  %v2679_v22 = vadd.f32 %v2663_v16, %v4663_v55  ;;  %v2681_v23 = vadd.f32 %v2665_v37, %v4666_v2 }
0x102f   : > { %v2666_v26 = vmul.f32 0.044715, %v2650_v34  ;;  %v2668_v27 = vmul.f32 0.044715, %v2652_v17  ;;  %v2651_v28 = vmul.f32 %v2635_v15, %v4687_v9  ;;  %v2653_v30 = vmul.f32 %v2637_v19, %v4690_v11  ;;  %v2572_v54 = vpop.f32.mrf.mxu1  ;;  %v2625_v29 = vpop.f32.mrf.mxu0 }
0x1030   : > { %4001 = vtanh.f32 %v2694_v20  ;;  %v2695_v38 = vmul.f32 0.7978846, %v2679_v22  ;;  %v2697_v39 = vmul.f32 0.7978846, %v2681_v23  ;;  %v4705_v61 = vadd.f32 %v2568_v12, %v4644_v49 }
0x1031   : > { %4003 = vtanh.f32 %v2696_v21  ;;  %v2682_v42 = vadd.f32 %v2666_v26, %v4675_v40  ;;  %v2684_v62 = vadd.f32 %v2668_v27, %v4678_v1  ;;  %v2667_v44 = vmul.f32 0.044715, %v2651_v28  ;;  %v2574_v36 = vpop.f32.mrf.mxu1  ;;  %v2627_v12 = vpop.f32.mrf.mxu0 }
0x1032   : > { %4005 = vtanh.f32 %v2695_v38  ;;  %v2669_v46 = vmul.f32 0.044715, %v2653_v30  ;;  %v2638_v47 = vmul.f32 %v4705_v61, %v4705_v61  ;;  %v4712_v18 = vadd.f32 %v2621_v10, %v4646_v50 }
0x1033   : > { %4007 = vtanh.f32 %v2697_v39  ;;  %v2698_v51 = vmul.f32 0.7978846, %v2682_v42  ;;  %v2700_v58 = vmul.f32 0.7978846, %v2684_v62  ;;  %v2683_v59 = vadd.f32 %v2667_v44, %v4687_v9 }
0x1034   : > { %v2685_v35 = vadd.f32 %v2669_v46, %v4690_v11  ;;  %v2654_v60 = vmul.f32 %v2638_v47, %v4705_v61  ;;  %v2640_v3 = vmul.f32 %v4712_v18, %v4712_v18  ;;  %v4720_v4 = vadd.f32 %v2570_v25, %v4648_v52 }
0x1035   : > { %4009 = vtanh.f32 %v2698_v51  ;;  %v2699_v24 = vmul.f32 0.7978846, %v2683_v59  ;;  %v4723_v41 = vadd.f32 %v2623_v31, %v4650_v53  ;;  %v4726_v5 = vadd.f32 %v2572_v54, %v4644_v49 }
0x1036   : > { %4011 = vtanh.f32 %v2700_v58  ;;  %v2701_v32 = vmul.f32 0.7978846, %v2685_v35  ;;  %v2670_v33 = vmul.f32 0.044715, %v2654_v60  ;;  %v2656_v43 = vmul.f32 %v2640_v3, %v4712_v18 }
0x1037   : > { %4013 = vtanh.f32 %v2699_v24  ;;  %v2639_v6 = vmul.f32 %v4720_v4, %v4720_v4  ;;  %v2641_v7 = vmul.f32 %v4723_v41, %v4723_v41  ;;  %v2642_v8 = vmul.f32 %v4726_v5, %v4726_v5 }
0x1038   : > { %4015 = vtanh.f32 %v2701_v32  ;;  %v2686_v49 = vadd.f32 %v2670_v33, %v4705_v61  ;;  %v2672_v10 = vmul.f32 0.044715, %v2656_v43  ;;  %v4737_v13 = vadd.f32 %v2625_v29, %v4646_v50 }
0x1039   : > { %v2655_v14 = vmul.f32 %v2639_v6, %v4720_v4  ;;  %v2657_v16 = vmul.f32 %v2641_v7, %v4723_v41  ;;  %v2658_v37 = vmul.f32 %v2642_v8, %v4726_v5  ;;  %v4743_v34 = vadd.f32 %v2574_v36, %v4648_v52 }
0x103a   : > { %v2702_v17 = vmul.f32 0.7978846, %v2686_v49  ;;  %v2688_v15 = vadd.f32 %v2672_v10, %v4712_v18  ;;  %v2644_v19 = vmul.f32 %v4737_v13, %v4737_v13  ;;  %v4749_v20 = vadd.f32 %v2627_v12, %v4650_v53 }
0x103b   : > { %v2671_v50 = vmul.f32 0.044715, %v2655_v14  ;;  %v2673_v21 = vmul.f32 0.044715, %v2657_v16  ;;  %v2674_v22 = vmul.f32 0.044715, %v2658_v37  ;;  %v2643_v23 = vmul.f32 %v4743_v34, %v4743_v34 }
0x103c   : > { %v2704_v25 = vmul.f32 0.7978846, %v2688_v15  ;;  %v2660_v26 = vmul.f32 %v2644_v19, %v4737_v13  ;;  %v2645_v52 = vmul.f32 %v4749_v20, %v4749_v20  ;;  %4017 = vtanh.f32 %v2702_v17 }
0x103d   : > { %v4002_v27 = vpop.eup %4001  ;;  %v2687_v28 = vadd.f32 %v2671_v50, %v4720_v4  ;;  %v2689_v30 = vadd.f32 %v2673_v21, %v4723_v41  ;;  %v2690_v53 = vadd.f32 %v2674_v22, %v4726_v5  ;;  %v2659_v31 = vmul.f32 %v2643_v23, %v4743_v34 }
0x103e   : > { %v4004_v38 = vpop.eup %4003  ;;  %v2676_v39 = vmul.f32 0.044715, %v2660_v26  ;;  %v2661_v42 = vmul.f32 %v2645_v52, %v4749_v20  ;;  %4019 = vtanh.f32 %v2704_v25  ;;  %v2726_v60 = vadd.f32 1.0, %v4002_v27 }
0x103f   : > { %v4006_v62 = vpop.eup %4005  ;;  %v2703_v44 = vmul.f32 0.7978846, %v2687_v28  ;;  %v2705_v46 = vmul.f32 0.7978846, %v2689_v30  ;;  %v2706_v54 = vmul.f32 0.7978846, %v2690_v53 }
0x1040   : > { %v4008_v47 = vpop.eup %4007  ;;  %v2692_v51 = vadd.f32 %v2676_v39, %v4737_v13  ;;  %v2675_v58 = vmul.f32 0.044715, %v2659_v31  ;;  %v2677_v59 = vmul.f32 0.044715, %v2661_v42  ;;  %v2727_v29 = vadd.f32 1.0, %v4006_v62 }
0x1041   : > { %4021 = vtanh.f32 %v2703_v44  ;;  %v2728_v33 = vadd.f32 1.0, %v4004_v38  ;;  %v2729_v37 = vadd.f32 1.0, %v4008_v47  ;;  %v2742_v17 = vmul.f32 0.5, %v2726_v60 }
0x1042   : > { %v4010_v35 = vpop.eup %4009  ;;  %4023 = vtanh.f32 %v2705_v46  ;;  %v2708_v3 = vmul.f32 0.7978846, %v2692_v51  ;;  %v2691_v24 = vadd.f32 %v2675_v58, %v4743_v34  ;;  %v2693_v36 = vadd.f32 %v2677_v59, %v4749_v20 }
0x1043   : > { %v4012_v32 = vpop.eup %4011  ;;  %v2730_v43 = vadd.f32 1.0, %v4010_v35  ;;  %4025 = vtanh.f32 %v2706_v54  ;;  %v2743_v12 = vmul.f32 0.5, %v2727_v29  ;;  %v2744_v50 = vmul.f32 0.5, %v2728_v33 }
0x1044   : > { %v4014_v6 = vpop.eup %4013  ;;  %v2732_v7 = vadd.f32 1.0, %v4012_v32  ;;  %4027 = vtanh.f32 %v2708_v3  ;;  %v2707_v8 = vmul.f32 0.7978846, %v2691_v24  ;;  %v2709_v14 = vmul.f32 0.7978846, %v2693_v36 }
0x1045   : > { %v4016_v49 = vpop.eup %4015  ;;  %v2746_v10 = vmul.f32 0.5, %v2730_v43  ;;  %v2731_v16 = vadd.f32 1.0, %v4014_v6  ;;  %v2745_v22 = vmul.f32 0.5, %v2729_v37  ;;  %v2759_v52 = vmul.f32 %v2743_v12, %v4663_v55 }
0x1046   : > { %v2748_v15 = vmul.f32 0.5, %v2732_v7  ;;  %4029 = vtanh.f32 %v2707_v8  ;;  %v2733_v19 = vadd.f32 1.0, %v4016_v49  ;;  %v2758_v28 = vmul.f32 %v2742_v17, %v4653_v56 }
0x1047   : > { %4031 = vtanh.f32 %v2709_v14  ;;  %v2747_v21 = vmul.f32 0.5, %v2731_v16  ;;  %v2762_v23 = vmul.f32 %v2746_v10, %v4675_v40  ;;  %v2761_v30 = vmul.f32 %v2745_v22, %v4666_v2 }
0x1048   : > { %v2749_v25 = vmul.f32 0.5, %v2733_v19  ;;  %v2764_v26 = vmul.f32 %v2748_v15, %v4678_v1  ;;  %v2760_v31 = vmul.f32 %v2744_v50, %v4656_v57 }
0x1049   : > { %v2763_v27 = vmul.f32 %v2747_v21, %v4687_v9  ;;  %v4018_v39 = vpop.eup %4017  ;;  %v2774_v42 = vpack.c.bf16 %v2762_v23, %v2758_v28 }
0x104a   : > { %v2765_v53 = vmul.f32 %v2749_v25, %v4690_v11  ;;  %v2776_v44 = vpack.c.bf16 %v2764_v26, %v2760_v31  ;;  %v2734_v47 = vadd.f32 1.0, %v4018_v39 }
0x104b   : > { %v2775_v38 = vpack.c.bf16 %v2763_v27, %v2759_v52  ;;  %v4020_v40 = vpop.eup %4019 }
0x104c   : > { %v2777_v62 = vpack.c.bf16 %v2765_v53, %v2761_v30  ;;  %v2736_v54 = vadd.f32 1.0, %v4020_v40  ;;  %v2750_v32 = vmul.f32 0.5, %v2734_v47 }
0x104d   : > { %3077 = vmatprep.mubr.bf16.mxu1 %v2775_v38 }
0x104e   : > { %v4022_v1 = vpop.eup %4021  ;;  %3126 = vmatprep.mubr.bf16.mxu0 %v2777_v62  ;;  %3078 = vmatmul.mubr.bf16.vlgmr.msra.gmra.mxu1 %v2774_v42  ;;  %v2752_v43 = vmul.f32 0.5, %v2736_v54  ;;  %v2766_v14 = vmul.f32 %v2750_v32, %v4705_v61 }
0x104f   : > { %v4024_v55 = vpop.eup %4023  ;;  %3127 = vmatmul.mubr.bf16.vlgmr.msra.gmra.mxu0 %v2776_v44  ;;  %v2735_v56 = vadd.f32 1.0, %v4022_v1 }
0x1050   : > { %v4026_v9 = vpop.eup %4025  ;;  %v2737_v2 = vadd.f32 1.0, %v4024_v55  ;;  %v2768_v37 = vmul.f32 %v2752_v43, %v4712_v18 }
0x1051   : > { %v4028_v46 = vpop.eup %4027  ;;  %v2738_v11 = vadd.f32 1.0, %v4026_v9  ;;  %v2751_v35 = vmul.f32 0.5, %v2735_v56 }
0x1052   : > { %v2740_v57 = vadd.f32 1.0, %v4028_v46  ;;  %v2753_v24 = vmul.f32 0.5, %v2737_v2 }
0x1053   : > { %v4030_v51 = vpop.eup %4029  ;;  %v2754_v58 = vmul.f32 0.5, %v2738_v11  ;;  %v2767_v7 = vmul.f32 %v2751_v35, %v4720_v4 }
0x1054   : > { %v4032_v59 = vpop.eup %4031  ;;  %v2739_v29 = vadd.f32 1.0, %v4030_v51  ;;  %v2756_v60 = vmul.f32 0.5, %v2740_v57  ;;  %v2769_v49 = vmul.f32 %v2753_v24, %v4723_v41  ;;  %v3458_v41 = vld [vmem:[%s602_s13] ss:$0 sm:$0xff] }
0x1055   : > { %v2741_v3 = vadd.f32 1.0, %v4032_v59  ;;  %v2770_v6 = vmul.f32 %v2754_v58, %v4726_v5 }
0x1056   : > { %v2755_v33 = vmul.f32 0.5, %v2739_v29  ;;  %v2772_v12 = vmul.f32 %v2756_v60, %v4737_v13 }
0x1057   : > { %v2757_v36 = vmul.f32 0.5, %v2741_v3  ;;  %v2778_v15 = vpack.c.bf16 %v2770_v6, %v2766_v14 }
0x1058   : > { %v2771_v8 = vmul.f32 %v2755_v33, %v4743_v34  ;;  %v2780_v5 = vpack.c.bf16 %v2772_v12, %v2768_v37 }
0x1059   : > { %v2773_v10 = vmul.f32 %v2757_v36, %v4749_v20 }
0x105a   : > { %v2779_v16 = vpack.c.bf16 %v2771_v8, %v2767_v7 }
0x105b   : > { %v2781_v17 = vpack.c.bf16 %v2773_v10, %v2769_v49 }
0x105c   : > { %3085 = vmatprep.mubr.bf16.mxu1 %v2779_v16 }
0x105d   : > { %3134 = vmatprep.mubr.bf16.mxu0 %v2781_v17  ;;  %3086 = vmatmul.mubr.bf16.gmra.mxu1 %v2778_v15 }
0x105e   : > { %3135 = vmatmul.mubr.bf16.gmra.mxu0 %v2780_v5 }
0x110e   : > { %v3573_v4 = vpop.f32.mrf.mxu1 }
0x110f   : > { %v3601_v34 = vpop.f32.mrf.mxu0 }
0x1110   : > { %v3574_v13 = vpop.f32.mrf.mxu1 }
0x1111   : > { %v3575_v20 = vadd.f32 %v3574_v13, %v3573_v4  ;;  %v3602_v61 = vpop.f32.mrf.mxu0 }
0x1112   : > { %v3576_v19 = vpop.f32.mrf.mxu1  ;;  %v3603_v18 = vadd.f32 %v3602_v61, %v3601_v34 }
0x1113   : > { %v3080_v50 = vadd.f32 %v3575_v20, %v3458_v41  ;;  %v3604_v21 = vpop.f32.mrf.mxu0 }
0x1114   : > { %v3577_v22 = vpop.f32.mrf.mxu1 }
0x1115   : > { %v3129_v23 = vadd.f32 %v3603_v18, %v3080_v50  ;;  %v3578_v25 = vadd.f32 %v3577_v22, %v3576_v19  ;;  %v3605_v26 = vpop.f32.mrf.mxu0 }
0x1116   : > { %v3606_v28 = vadd.f32 %v3605_v26, %v3604_v21 }
0x1117   : > { %v3143_v52 = vadd.f32 %v3129_v23, %v4528_v45  ;;  %v3083_v27 = vadd.f32 %v3578_v25, %v3458_v41 }
0x1119   : > { %3147 = vst [vmem:[#allocation2 + $0x10] sm:$0xff] %v3143_v52  ;;  %v3132_v30 = vadd.f32 %v3606_v28, %v3083_v27 }
0x111b   : > { %v3144_v53 = vadd.f32 %v3132_v30, %v4535_v48 }
0x111d   : > { %3148 = vst [vmem:[#allocation2] sm:$0xff] %v3144_v53  ;;  %v3579_v31 = vpop.f32.mrf.mxu1 }
0x111e   : > { %v3607_v38 = vpop.f32.mrf.mxu0 }
0x111f   : > { %v3580_v39 = vpop.f32.mrf.mxu1 }
0x1120   : > { %v3581_v42 = vadd.f32 %v3580_v39, %v3579_v31  ;;  %v3608_v62 = vpop.f32.mrf.mxu0 }
0x1121   : > { %v3582_v40 = vpop.f32.mrf.mxu1  ;;  %v3609_v1 = vadd.f32 %v3608_v62, %v3607_v38 }
0x1122   : > { %v3088_v44 = vadd.f32 %v3581_v42, %v3458_v41  ;;  %v3610_v55 = vpop.f32.mrf.mxu0 }
0x1123   : > { %v3583_v9 = vpop.f32.mrf.mxu1 }
0x1124   : > { %v3137_v56 = vadd.f32 %v3609_v1, %v3088_v44  ;;  %v3584_v46 = vadd.f32 %v3583_v9, %v3582_v40  ;;  %v3611_v45 = vpop.f32.mrf.mxu0 }
0x1125   : > { %v3612_v11 = vadd.f32 %v3611_v45, %v3610_v55 }
0x1126   : > { %v3145_v2 = vadd.f32 %v3137_v56, %v4540_v0  ;;  %v3091_v47 = vadd.f32 %v3584_v46, %v3458_v41 }
0x1128   : > { %3149 = vst [vmem:[#allocation2 + $0x18] sm:$0xff] %v3145_v2  ;;  %v3140_v48 = vadd.f32 %v3612_v11, %v3091_v47  ;;  %3154 = sbr.rel (%p3491_p6) target bundleno = 4399 (0x112f), region = 76 }
0x112a   : > { %v3146_v54 = vadd.f32 %v3140_v48, %v4532_v63 }
0x112c   : > { %3150 = vst [vmem:[#allocation2 + $0x8] sm:$0xff] %v3146_v54 }
0x112d   : > { %3155 = vst [vmem:[#allocation3] sm:$0xff] %v3143_v52  ;;  %3156 = vst [vmem:[#allocation3 + $0x8] sm:$0xff] %v3144_v53 }
0x112e   : > { %3157 = vst [vmem:[#allocation3 + $0x10] sm:$0xff] %v3145_v2  ;;  %3158 = vst [vmem:[#allocation3 + $0x18] sm:$0xff] %v3146_v54 }
0x112f PF: > { %s4841_s26 = sld [smem:[#allocation7_spill]]  ;;  %s4095_s29 = smov [#allocation3]  }
0x1130   : > { %s3169_s14 = sshll.u32 %s4095_s29, 4  ;;  %s3170_s14 = int_to_ptr.vmem [resolvable:$true] %s3169_s14 }
0x1131   : > { %s4037_s16 = scalar_lea.vmem %s3170_s14, 512  ;;  %p4044_p11 = scmp.lt.s32.totalorder %s3170_s14, %s3170_s14 }
0x1132   : > { %p4038_p8 = scmp.ne.s32.totalorder %s3170_s14, %s4037_s16  ;;  %p4045_p12 = scmp.lt.s32.totalorder %s4037_s16, %s4037_s16 }
0x1134   : > { %p4046_p13 = por %p4045_p12, %p4044_p11 }
0x1135   : > { %s4842_s12 = sadd.s32 4294967295, %s4841_s26  }
0x1136   : > { %p4792_p7 = scmp.eq.s32.totalorder %s4842_s12, 1 }
0x1138   : > { %p4039_p9 = pnand %p4038_p8, %p4792_p7 }
0x113a   : > { %p4040_p10 = pneg %p4039_p9 }
0x113c   : > { %p4047_p0 = pnand %p4046_p13, %p4040_p10 }
0x113e   : > { %4050 = shalt.err (!%p4047_p0)
}
0x113f   : > { %s4096_s21 = smov 128   ;;  %s4097_s18 = smov 8  }
0x1140   : > { %s4844_s27 = sld [smem:[#allocation10_spill]] }
0x1146   : > { %3763 = dma.vmem_to_hbm [thread:$0]  (%p4792_p7), %s3170_s14, 512, %s4844_s27, [#allocation4], %s4096_s21, %s4096_s21, %s4097_s18  }
0x1147   : > { %4074 = dma.done.wait (%p4792_p7), [#allocation4], 512  }
0x1148   : > { %4076 = vsyncadd (%p4792_p7), [#allocation4], 4294966784 }
0x1149 PF: > { %s4845_s17 = sld [smem:[#allocation7_spill]] }
0x114a   : > { %s4846_s21 = sld [smem:[#allocation6_spill]] }
0x114b   : > { %s4847_s22 = sld [smem:[#allocation8_spill]] }
0x114f   : > { %s23_s23 = sadd.s32 1, %s4845_s17  }
0x1150   : > { %p20_p1 = scmp.ge.s32.totalorder %s23_s23, 4  }
0x1152   :  { %22 = sbr.rel (!%p20_p1) target bundleno = 5 (0x5), region = 140 }
0x1157   :  { %3185 = vsyncpa [#allocation4], 1 }
0x1158   :  { %3187 = vsyncpa [#allocation4 + $0x1], 1 }

</bundles_post_ra>
